<compile_context>
chip_gen: v5e
topology: v5e:2x2
jax: 0.10.0
libtpu: 0.0.40
codegen_flags: <defaults>
</compile_context>

<pallas_src>
import jax
import jax.numpy as jnp
from jax import lax
from jax.experimental import pallas as pl
from jax.experimental.pallas import tpu as pltpu


def _make_resblock_kernel(H, W, Hp, Wp, Cin, Cout):
    """Build the fused resblock kernel for one batch element."""
    NPIX = Hp * Wp
    assert Wp & (Wp - 1) == 0, "Wp must be a power of two (cheap iota mask)"
    wp_log2 = Wp.bit_length() - 1

    # Tap (ky,kx) of a 3x3 "same" conv reads flattened input pixel p + s with
    # s = (ky-1)*Wp + (kx-1).  jnp/pltpu roll semantics: result[i] = x[i-shift]
    # => shift = -s (taken mod NPIX so it is a non-negative static int).
    shifts = [(-((ky - 1) * Wp + (kx - 1))) % NPIX
              for ky in range(3) for kx in range(3)]

    def im2col(src):
        # src: (C, NPIX) -> (9*C, NPIX).  One static lane-roll per tap (XLU);
        # wrap-around only pollutes pixels outside the HxW footprint, which
        # are masked / sliced away.
        taps = [src if s == 0 else pltpu.roll(src, s, axis=1) for s in shifts]
        return jnp.concatenate(taps, axis=0)

    def kernel(x_ref, w1a_ref, w1b_ref, b1a_ref, b1b_ref,
               w2a_ref, w2b_ref, b2a_ref, b2b_ref, out_ref):
        # x_ref : (1, Cin, NPIX)  image embedded at (2,2) in a zero canvas
        # w*    : (Cout, 9*Cin)   flipped weight slabs, one per MFM half
        # b*    : (Cout, 1)       bias halves (broadcast over pixels/lanes)
        # out   : (1, Cout, NPIX)
        xf = x_ref[0].astype(jnp.float32)                       # (Cin, NPIX)

        # ---- conv1 + MFM: one K=9*Cin matmul per half, pixels on lanes ----
        strip1 = im2col(xf)                                     # (9*Cin, NPIX)
        h1a = jnp.dot(w1a_ref[...], strip1,
                      preferred_element_type=jnp.float32) + b1a_ref[...]
        h1b = jnp.dot(w1b_ref[...], strip1,
                      preferred_element_type=jnp.float32) + b1b_ref[...]
        mfm1 = jnp.maximum(h1a, h1b)                            # (Cout, NPIX)

        # Zero everything outside the HxW footprint: this IS conv2's zero
        # padding, produced entirely in VMEM (Wp is a power of two, so the
        # row/col ids are a shift and an AND of a single lane iota).
        pix = lax.broadcasted_iota(jnp.int32, (1, NPIX), 1)
        rid = jnp.right_shift(pix, wp_log2)
        cid = jnp.bitwise_and(pix, Wp - 1)
        inside = (rid >= 2) & (rid < 2 + H) & (cid >= 2) & (cid < 2 + W)
        mid = jnp.where(inside, mfm1, 0.0)                      # (Cout, NPIX)

        # ---- conv2 + MFM -------------------------------------------------
        strip2 = im2col(mid)                                    # (9*Cout, NPIX)
        h2a = jnp.dot(w2a_ref[...], strip2,
                      preferred_element_type=jnp.float32) + b2a_ref[...]
        h2b = jnp.dot(w2b_ref[...], strip2,
                      preferred_element_type=jnp.float32) + b2b_ref[...]
        mfm2 = jnp.maximum(h2a, h2b)                            # (Cout, NPIX)

        # ---- residual add: xf IS the residual in this layout (zero ring) --
        out_ref[0, :, :] = (mfm2 + xf).astype(out_ref.dtype)

    return kernel


def resblock_v1_forward(x_nchw, params):
    """Full resblock_v1 forward.  x_nchw: (B, C, H, W) like PyTorch."""
    B, C, H, W = x_nchw.shape
    Cout = params["w1"].shape[-1] // 2
    assert Cout == C, "resblock_v1 requires in_channels == out_channels"

    # Lane-dense canvas: image at offset (2,2) inside (Hp, Wp), Wp a power of
    # two >= W+3 and Hp chosen so Hp*Wp is a multiple of 128.
    Wp = max(32, 1 << (W + 2).bit_length())
    row_mult = max(1, 128 // Wp)
    Hp = -(-(H + 3) // row_mult) * row_mult
    NPIX = Hp * Wp

    xpad = jnp.pad(x_nchw, ((0, 0), (0, 0), (2, Hp - H - 2), (2, Wp - W - 2)))
    xflat = xpad.reshape(B, C, NPIX)

    def split_w(w):  # HWIO (3,3,cin,2*Cout) -> two flipped (Cout, 9*cin) slabs
        cin = w.shape[2]
        wa = jnp.transpose(w[..., :Cout], (3, 0, 1, 2)).reshape(Cout, 9 * cin)
        wb = jnp.transpose(w[..., Cout:], (3, 0, 1, 2)).reshape(Cout, 9 * cin)
        return wa, wb

    w1a, w1b = split_w(params["w1"])
    w2a, w2b = split_w(params["w2"])
    b1a = params["b1"][:Cout].reshape(Cout, 1)
    b1b = params["b1"][Cout:].reshape(Cout, 1)
    b2a = params["b2"][:Cout].reshape(Cout, 1)
    b2b = params["b2"][Cout:].reshape(Cout, 1)

    kernel = _make_resblock_kernel(H, W, Hp, Wp, C, Cout)

    wspec1 = pl.BlockSpec((Cout, 9 * C), lambda b: (0, 0))
    wspec2 = pl.BlockSpec((Cout, 9 * Cout), lambda b: (0, 0))
    bspec = pl.BlockSpec((Cout, 1), lambda b: (0, 0))

    out_flat = pl.pallas_call(
        kernel,
        out_shape=jax.ShapeDtypeStruct((B, Cout, NPIX), x_nchw.dtype),
        grid_spec=pltpu.PrefetchScalarGridSpec(
            num_scalar_prefetch=0,
            grid=(B,),
            in_specs=[
                pl.BlockSpec((1, C, NPIX), lambda b: (b, 0, 0)),
                wspec1, wspec1, bspec, bspec,
                wspec2, wspec2, bspec, bspec,
            ],
            out_specs=pl.BlockSpec((1, Cout, NPIX), lambda b: (b, 0, 0)),
        ),
        compiler_params=pltpu.CompilerParams(
            dimension_semantics=("parallel",)),
    )(xflat, w1a, w1b, b1a, b1b, w2a, w2b, b2a, b2b)

    # Wrapper-side layout plumbing: slice the HxW footprint back out (NCHW).
    out = out_flat.reshape(B, Cout, Hp, Wp)[:, :, 2:2 + H, 2:2 + W]
    return out


def init_params(key, in_channels, out_channels):
    """Deterministic init mimicking PyTorch Conv2d default (uniform +-1/sqrt(fan_in))."""
    k1, k2, k3, k4 = jax.random.split(key, 4)
    fan_in1 = in_channels * 9
    fan_in2 = out_channels * 9
    bnd1 = 1.0 / jnp.sqrt(fan_in1)
    bnd2 = 1.0 / jnp.sqrt(fan_in2)
    # weights stored in HWIO layout
    w1 = jax.random.uniform(k1, (3, 3, in_channels, 2 * out_channels),
                            jnp.float32, -bnd1, bnd1)
    b1 = jax.random.uniform(k2, (2 * out_channels,), jnp.float32, -bnd1, bnd1)
    w2 = jax.random.uniform(k3, (3, 3, out_channels, 2 * out_channels),
                            jnp.float32, -bnd2, bnd2)
    b2 = jax.random.uniform(k4, (2 * out_channels,), jnp.float32, -bnd2, bnd2)
    return {"w1": w1, "b1": b1, "w2": w2, "b2": b2}


def _reference_forward(x_nchw, params):
    """Pure-JAX reference (lax.conv) for a correctness cross-check."""
    x = jnp.transpose(x_nchw, (0, 2, 3, 1))
    dn = ("NHWC", "HWIO", "NHWC")

    def mfm_layer(inp, w, b):
        y = lax.conv_general_dilated(inp, w, (1, 1), ((1, 1), (1, 1)),
                                     dimension_numbers=dn) + b
        c = y.shape[-1] // 2
        return jnp.maximum(y[..., :c], y[..., c:])

    out = mfm_layer(x, params["w1"], params["b1"])
    out = mfm_layer(out, params["w2"], params["b2"]) + x
    return jnp.transpose(out, (0, 3, 1, 2))


if __name__ == "__main__":
    B, C, H, W = 2, 4, 16, 16  # resblock requires in_channels == out_channels
    key = jax.random.PRNGKey(0)
    kx, kp = jax.random.split(key)
    x = jax.random.normal(kx, (B, C, H, W), jnp.float32)
    params = init_params(kp, C, C)

    out = resblock_v1_forward(x, params)
    out = jax.block_until_ready(out)

    ref = _reference_forward(x, params)
    assert out.shape == (B, C, H, W)
    # f32 matmuls on the MXU use multi-pass bf16; keep a small tolerance margin.
    assert jnp.allclose(out, ref, atol=1e-3, rtol=1e-3), "mismatch vs JAX reference"

    print("KERNEL_OK")
</pallas_src>

<mosaic_0001>
module attributes {stable_mosaic.version = 11 : i64} {
  func.func @kernel(%arg0: i32, %arg1: memref<1x4x640xf32, #tpu.memory_space<vmem>>, %arg2: memref<4x36xf32, #tpu.memory_space<vmem>>, %arg3: memref<4x36xf32, #tpu.memory_space<vmem>>, %arg4: memref<4x1xf32, #tpu.memory_space<vmem>>, %arg5: memref<4x1xf32, #tpu.memory_space<vmem>>, %arg6: memref<4x36xf32, #tpu.memory_space<vmem>>, %arg7: memref<4x36xf32, #tpu.memory_space<vmem>>, %arg8: memref<4x1xf32, #tpu.memory_space<vmem>>, %arg9: memref<4x1xf32, #tpu.memory_space<vmem>>, %arg10: memref<1x4x640xf32, #tpu.memory_space<vmem>>) attributes {dimension_semantics = [#tpu.dimension_semantics<parallel>], iteration_bounds = array<i64: 2>, scalar_prefetch = 0 : i64, scratch_operands = 0 : i64, tpu.core_type = #tpu.core_type<tc>, window_params = [{transform_indices = @transform_0, window_bounds = array<i64: 1, 4, 640>}, {pipeline_mode = #tpu.pipeline_mode<synchronous>, transform_indices = @transform_1, window_bounds = array<i64: 4, 36>}, {pipeline_mode = #tpu.pipeline_mode<synchronous>, transform_indices = @transform_2, window_bounds = array<i64: 4, 36>}, {pipeline_mode = #tpu.pipeline_mode<synchronous>, transform_indices = @transform_3, window_bounds = array<i64: 4, 1>}, {pipeline_mode = #tpu.pipeline_mode<synchronous>, transform_indices = @transform_4, window_bounds = array<i64: 4, 1>}, {pipeline_mode = #tpu.pipeline_mode<synchronous>, transform_indices = @transform_5, window_bounds = array<i64: 4, 36>}, {pipeline_mode = #tpu.pipeline_mode<synchronous>, transform_indices = @transform_6, window_bounds = array<i64: 4, 36>}, {pipeline_mode = #tpu.pipeline_mode<synchronous>, transform_indices = @transform_7, window_bounds = array<i64: 4, 1>}, {pipeline_mode = #tpu.pipeline_mode<synchronous>, transform_indices = @transform_8, window_bounds = array<i64: 4, 1>}, {transform_indices = @transform_9, window_bounds = array<i64: 1, 4, 640>}]} {
    %c0 = arith.constant 0 : index
    %c0_0 = arith.constant 0 : index
    %c0_1 = arith.constant 0 : index
    %0 = vector.load %arg1[%c0, %c0_0, %c0_1] : memref<1x4x640xf32, #tpu.memory_space<vmem>>, vector<1x4x640xf32>
    %1 = vector.shape_cast %0 : vector<1x4x640xf32> to vector<4x640xf32>
    %c33_i32 = arith.constant 33 : i32
    %2 = tpu.dynamic_rotate %1 by %c33_i32 dim 1 : vector<4x640xf32>, i32 -> vector<4x640xf32>
    %c32_i32 = arith.constant 32 : i32
    %3 = tpu.dynamic_rotate %1 by %c32_i32 dim 1 : vector<4x640xf32>, i32 -> vector<4x640xf32>
    %c31_i32 = arith.constant 31 : i32
    %4 = tpu.dynamic_rotate %1 by %c31_i32 dim 1 : vector<4x640xf32>, i32 -> vector<4x640xf32>
    %c1_i32 = arith.constant 1 : i32
    %5 = tpu.dynamic_rotate %1 by %c1_i32 dim 1 : vector<4x640xf32>, i32 -> vector<4x640xf32>
    %c639_i32 = arith.constant 639 : i32
    %6 = tpu.dynamic_rotate %1 by %c639_i32 dim 1 : vector<4x640xf32>, i32 -> vector<4x640xf32>
    %c609_i32 = arith.constant 609 : i32
    %7 = tpu.dynamic_rotate %1 by %c609_i32 dim 1 : vector<4x640xf32>, i32 -> vector<4x640xf32>
    %c608_i32 = arith.constant 608 : i32
    %8 = tpu.dynamic_rotate %1 by %c608_i32 dim 1 : vector<4x640xf32>, i32 -> vector<4x640xf32>
    %c607_i32 = arith.constant 607 : i32
    %9 = tpu.dynamic_rotate %1 by %c607_i32 dim 1 : vector<4x640xf32>, i32 -> vector<4x640xf32>
    %10 = tpu.concatenate %2, %3, %4, %5, %1, %6, %7, %8, %9 in 0 : vector<4x640xf32>, vector<4x640xf32>, vector<4x640xf32>, vector<4x640xf32>, vector<4x640xf32>, vector<4x640xf32>, vector<4x640xf32>, vector<4x640xf32>, vector<4x640xf32> -> vector<36x640xf32>
    %c0_2 = arith.constant 0 : index
    %c0_3 = arith.constant 0 : index
    %11 = vector.load %arg2[%c0_2, %c0_3] : memref<4x36xf32, #tpu.memory_space<vmem>>, vector<4x36xf32>
    %cst = arith.constant dense<0.000000e+00> : vector<4x640xf32>
    %12 = tpu.matmul %11, %10, %cst {dimension_numbers = #tpu.dot_dimension_numbers<[1], [0], [0], [1], [0, 0, 1, 1], [], []>} : vector<4x36xf32>, vector<36x640xf32>, vector<4x640xf32> -> vector<4x640xf32>
    %c0_4 = arith.constant 0 : index
    %c0_5 = arith.constant 0 : index
    %13 = vector.load %arg4[%c0_4, %c0_5] : memref<4x1xf32, #tpu.memory_space<vmem>>, vector<4x1xf32>
    %14 = vector.broadcast %13 : vector<4x1xf32> to vector<4x640xf32>
    %15 = arith.addf %12, %14 : vector<4x640xf32>
    %c0_6 = arith.constant 0 : index
    %c0_7 = arith.constant 0 : index
    %16 = vector.load %arg3[%c0_6, %c0_7] : memref<4x36xf32, #tpu.memory_space<vmem>>, vector<4x36xf32>
    %cst_8 = arith.constant dense<0.000000e+00> : vector<4x640xf32>
    %17 = tpu.matmul %16, %10, %cst_8 {dimension_numbers = #tpu.dot_dimension_numbers<[1], [0], [0], [1], [0, 0, 1, 1], [], []>} : vector<4x36xf32>, vector<36x640xf32>, vector<4x640xf32> -> vector<4x640xf32>
    %c0_9 = arith.constant 0 : index
    %c0_10 = arith.constant 0 : index
    %18 = vector.load %arg5[%c0_9, %c0_10] : memref<4x1xf32, #tpu.memory_space<vmem>>, vector<4x1xf32>
    %19 = vector.broadcast %18 : vector<4x1xf32> to vector<4x640xf32>
    %20 = arith.addf %17, %19 : vector<4x640xf32>
    %21 = arith.maximumf %15, %20 : vector<4x640xf32>
    %22 = tpu.iota {dimensions = array<i32: 1>} : vector<1x640xi32>
    %c5_i32 = arith.constant 5 : i32
    %23 = vector.broadcast %c5_i32 : i32 to vector<1x640xi32>
    %24 = arith.shrsi %22, %23 : vector<1x640xi32>
    %c31_i32_11 = arith.constant 31 : i32
    %25 = vector.broadcast %c31_i32_11 : i32 to vector<1x640xi32>
    %26 = arith.andi %22, %25 : vector<1x640xi32>
    %c2_i32 = arith.constant 2 : i32
    %27 = vector.broadcast %c2_i32 : i32 to vector<1x640xi32>
    %28 = arith.cmpi sge, %24, %27 : vector<1x640xi32>
    %c18_i32 = arith.constant 18 : i32
    %29 = vector.broadcast %c18_i32 : i32 to vector<1x640xi32>
    %30 = arith.cmpi slt, %24, %29 : vector<1x640xi32>
    %31 = arith.andi %28, %30 : vector<1x640xi1>
    %c2_i32_12 = arith.constant 2 : i32
    %32 = vector.broadcast %c2_i32_12 : i32 to vector<1x640xi32>
    %33 = arith.cmpi sge, %26, %32 : vector<1x640xi32>
    %34 = arith.andi %31, %33 : vector<1x640xi1>
    %c18_i32_13 = arith.constant 18 : i32
    %35 = vector.broadcast %c18_i32_13 : i32 to vector<1x640xi32>
    %36 = arith.cmpi slt, %26, %35 : vector<1x640xi32>
    %37 = arith.andi %34, %36 : vector<1x640xi1>
    %cst_14 = arith.constant 0.000000e+00 : f32
    %38 = vector.shape_cast %37 : vector<1x640xi1> to vector<1x640xi1>
    %39 = vector.broadcast %38 : vector<1x640xi1> to vector<4x640xi1>
    %40 = vector.broadcast %cst_14 : f32 to vector<4x640xf32>
    %41 = arith.select %39, %21, %40 : vector<4x640xi1>, vector<4x640xf32>
    %c33_i32_15 = arith.constant 33 : i32
    %42 = tpu.dynamic_rotate %41 by %c33_i32_15 dim 1 : vector<4x640xf32>, i32 -> vector<4x640xf32>
    %c32_i32_16 = arith.constant 32 : i32
    %43 = tpu.dynamic_rotate %41 by %c32_i32_16 dim 1 : vector<4x640xf32>, i32 -> vector<4x640xf32>
    %c31_i32_17 = arith.constant 31 : i32
    %44 = tpu.dynamic_rotate %41 by %c31_i32_17 dim 1 : vector<4x640xf32>, i32 -> vector<4x640xf32>
    %c1_i32_18 = arith.constant 1 : i32
    %45 = tpu.dynamic_rotate %41 by %c1_i32_18 dim 1 : vector<4x640xf32>, i32 -> vector<4x640xf32>
    %c639_i32_19 = arith.constant 639 : i32
    %46 = tpu.dynamic_rotate %41 by %c639_i32_19 dim 1 : vector<4x640xf32>, i32 -> vector<4x640xf32>
    %c609_i32_20 = arith.constant 609 : i32
    %47 = tpu.dynamic_rotate %41 by %c609_i32_20 dim 1 : vector<4x640xf32>, i32 -> vector<4x640xf32>
    %c608_i32_21 = arith.constant 608 : i32
    %48 = tpu.dynamic_rotate %41 by %c608_i32_21 dim 1 : vector<4x640xf32>, i32 -> vector<4x640xf32>
    %c607_i32_22 = arith.constant 607 : i32
    %49 = tpu.dynamic_rotate %41 by %c607_i32_22 dim 1 : vector<4x640xf32>, i32 -> vector<4x640xf32>
    %50 = tpu.concatenate %42, %43, %44, %45, %41, %46, %47, %48, %49 in 0 : vector<4x640xf32>, vector<4x640xf32>, vector<4x640xf32>, vector<4x640xf32>, vector<4x640xf32>, vector<4x640xf32>, vector<4x640xf32>, vector<4x640xf32>, vector<4x640xf32> -> vector<36x640xf32>
    %c0_23 = arith.constant 0 : index
    %c0_24 = arith.constant 0 : index
    %51 = vector.load %arg6[%c0_23, %c0_24] : memref<4x36xf32, #tpu.memory_space<vmem>>, vector<4x36xf32>
    %cst_25 = arith.constant dense<0.000000e+00> : vector<4x640xf32>
    %52 = tpu.matmul %51, %50, %cst_25 {dimension_numbers = #tpu.dot_dimension_numbers<[1], [0], [0], [1], [0, 0, 1, 1], [], []>} : vector<4x36xf32>, vector<36x640xf32>, vector<4x640xf32> -> vector<4x640xf32>
    %c0_26 = arith.constant 0 : index
    %c0_27 = arith.constant 0 : index
    %53 = vector.load %arg8[%c0_26, %c0_27] : memref<4x1xf32, #tpu.memory_space<vmem>>, vector<4x1xf32>
    %54 = vector.broadcast %53 : vector<4x1xf32> to vector<4x640xf32>
    %55 = arith.addf %52, %54 : vector<4x640xf32>
    %c0_28 = arith.constant 0 : index
    %c0_29 = arith.constant 0 : index
    %56 = vector.load %arg7[%c0_28, %c0_29] : memref<4x36xf32, #tpu.memory_space<vmem>>, vector<4x36xf32>
    %cst_30 = arith.constant dense<0.000000e+00> : vector<4x640xf32>
    %57 = tpu.matmul %56, %50, %cst_30 {dimension_numbers = #tpu.dot_dimension_numbers<[1], [0], [0], [1], [0, 0, 1, 1], [], []>} : vector<4x36xf32>, vector<36x640xf32>, vector<4x640xf32> -> vector<4x640xf32>
    %c0_31 = arith.constant 0 : index
    %c0_32 = arith.constant 0 : index
    %58 = vector.load %arg9[%c0_31, %c0_32] : memref<4x1xf32, #tpu.memory_space<vmem>>, vector<4x1xf32>
    %59 = vector.broadcast %58 : vector<4x1xf32> to vector<4x640xf32>
    %60 = arith.addf %57, %59 : vector<4x640xf32>
    %61 = arith.maximumf %55, %60 : vector<4x640xf32>
    %62 = arith.addf %61, %1 : vector<4x640xf32>
    %c0_33 = arith.constant 0 : index
    %c0_34 = arith.constant 0 : index
    %c0_35 = arith.constant 0 : index
    %63 = vector.load %arg10[%c0_33, %c0_34, %c0_35] : memref<1x4x640xf32, #tpu.memory_space<vmem>>, vector<1x4x640xf32>
    %64 = vector.shape_cast %63 : vector<1x4x640xf32> to vector<4x640xf32>
    %65 = vector.shape_cast %62 : vector<4x640xf32> to vector<1x4x640xf32>
    tpu.vector_store %arg10[%c0_33, %c0_34, %c0_35], %65 {strides = array<i32>} : memref<1x4x640xf32, #tpu.memory_space<vmem>>, vector<1x4x640xf32>,
    return
  }
  func.func @transform_0(%arg0: i32) -> (i32, i32, i32) {
    %c0_i32 = arith.constant 0 : i32
    %c0_i32_0 = arith.constant 0 : i32
    %c0_i32_1 = arith.constant 0 : i32
    return %arg0, %c0_i32, %c0_i32_0 : i32, i32, i32
  }
  func.func @transform_1(%arg0: i32) -> (i32, i32) {
    %c0_i32 = arith.constant 0 : i32
    %c0_i32_0 = arith.constant 0 : i32
    %c0_i32_1 = arith.constant 0 : i32
    return %c0_i32, %c0_i32_0 : i32, i32
  }
  func.func @transform_2(%arg0: i32) -> (i32, i32) {
    %c0_i32 = arith.constant 0 : i32
    %c0_i32_0 = arith.constant 0 : i32
    %c0_i32_1 = arith.constant 0 : i32
    return %c0_i32, %c0_i32_0 : i32, i32
  }
  func.func @transform_3(%arg0: i32) -> (i32, i32) {
    %c0_i32 = arith.constant 0 : i32
    %c0_i32_0 = arith.constant 0 : i32
    %c0_i32_1 = arith.constant 0 : i32
    return %c0_i32, %c0_i32_0 : i32, i32
  }
  func.func @transform_4(%arg0: i32) -> (i32, i32) {
    %c0_i32 = arith.constant 0 : i32
    %c0_i32_0 = arith.constant 0 : i32
    %c0_i32_1 = arith.constant 0 : i32
    return %c0_i32, %c0_i32_0 : i32, i32
  }
  func.func @transform_5(%arg0: i32) -> (i32, i32) {
    %c0_i32 = arith.constant 0 : i32
    %c0_i32_0 = arith.constant 0 : i32
    %c0_i32_1 = arith.constant 0 : i32
    return %c0_i32, %c0_i32_0 : i32, i32
  }
  func.func @transform_6(%arg0: i32) -> (i32, i32) {
    %c0_i32 = arith.constant 0 : i32
    %c0_i32_0 = arith.constant 0 : i32
    %c0_i32_1 = arith.constant 0 : i32
    return %c0_i32, %c0_i32_0 : i32, i32
  }
  func.func @transform_7(%arg0: i32) -> (i32, i32) {
    %c0_i32 = arith.constant 0 : i32
    %c0_i32_0 = arith.constant 0 : i32
    %c0_i32_1 = arith.constant 0 : i32
    return %c0_i32, %c0_i32_0 : i32, i32
  }
  func.func @transform_8(%arg0: i32) -> (i32, i32) {
    %c0_i32 = arith.constant 0 : i32
    %c0_i32_0 = arith.constant 0 : i32
    %c0_i32_1 = arith.constant 0 : i32
    return %c0_i32, %c0_i32_0 : i32, i32
  }
  func.func @transform_9(%arg0: i32) -> (i32, i32, i32) {
    %c0_i32 = arith.constant 0 : i32
    %c0_i32_0 = arith.constant 0 : i32
    %c0_i32_1 = arith.constant 0 : i32
    return %arg0, %c0_i32, %c0_i32_0 : i32, i32, i32
  }
}

</mosaic_0001>

<bundles_post_ra>
// kernel: tpu_custom_call.1
= control target key start
LH: loop header
LB: loop body
LE: loop exit
PB: predicated region body
PF: predicated region fallthrough
CT: control target
= control target key end

     0   :  { %14 = vsyncpa [#allocation3], 0  ;;  %s3018_s0 = inlined_call_operand.hbm [shape: f32[2,4,640], index: 0, kind: input, shape index: {}]   ;;  %s3019_s1 = inlined_call_operand.vmem [shape: f32[4,36], index: 1, kind: input, shape index: {}]   ;;  %s3020_s2 = inlined_call_operand.vmem [shape: f32[4,36], index: 2, kind: input, shape index: {}]   ;;  %s3021_s3 = inlined_call_operand.vmem [shape: f32[4,1], index: 3, kind: input, shape index: {}]   ;;  %s3022_s4 = inlined_call_operand.vmem [shape: f32[4,1], index: 4, kind: input, shape index: {}]   ;;  %s3023_s5 = inlined_call_operand.vmem [shape: f32[4,36], index: 5, kind: input, shape index: {}]   ;;  %s3024_s6 = inlined_call_operand.vmem [shape: f32[4,36], index: 6, kind: input, shape index: {}]   ;;  %s3025_s7 = inlined_call_operand.vmem [shape: f32[4,1], index: 7, kind: input, shape index: {}]   ;;  %s3026_s8 = inlined_call_operand.vmem [shape: f32[4,1], index: 8, kind: input, shape index: {}]   ;;  %s3027_s9 = inlined_call_operand.hbm [shape: f32[2,4,640], index: 9, kind: output, shape index: {}]  }
   0x1   :  { %16 = vsyncpa [#allocation3 + $0x1], 0 }
   0x2   :  { %17 = vsyncpa [#allocation4], 0 }
   0x3   :  { %19 = vsyncpa [#allocation4 + $0x1], 0  ;;  %s1975_s30 = smov 0   ;;  %s1977_s10 = smov 0  }
   0x4   :  { %s1979_s11 = smov 0   ;;  %s1981_s12 = smov 0  }
   0x5 LB: > { %3038 = sst [smem:[#allocation8_spill]] %s1910_s11  ;;  %s1996_s13 = sadd.s32 4294967295, %s1914_s12   ;;  %s1914_s12 = sphi %s1981_s12, %s3106_s12   ;;  %s1910_s11 = sphi %s1979_s11, %s3108_s11   ;;  %s1906_s10 = sphi %s1977_s10, %s3110_s10   ;;  %s1902_s30 = sphi %s1975_s30, %s3109_s30  }
   0x6   : > { %s1568_s14 = sadd.s32 4294967294, %s1914_s12   ;;  %s2000_s15 = sadd.s32 1, %s1914_s12  }
   0x7   : > { %3039 = sst [smem:[#allocation9_spill]] %s2000_s15  ;;  %s32_s16 = sadd.s32 1, %s1910_s11 }
   0x8   : > { %s29_s17 = ssub.s32 %s1914_s12, %s2000_s15  ;;  %p39_p0 = scmp.ne.s32.totalorder %s1910_s11, %s1906_s10 }
   0x9   : > { %p30_p1 = scmp.eq.s32.totalorder %s29_s17, 0  ;;  %p40_p2 = scmp.eq.s32.totalorder %s1914_s12, 0 }
   0xa   : > { %p45_p3 = scmp.ne.s32.totalorder %s1906_s10, %s1902_s30  ;;  %p46_p4 = scmp.eq.s32.totalorder %s1996_s13, 0 }
   0xb   : > { %s2012_s18 = scalar_select %p30_p1, %s1910_s11, %s32_s16  }
   0xc   : > { %p41_p5 = por %p40_p2, %p39_p0  ;;  %p2014_p6 = por %p46_p4, %p45_p3 }
   0xd   : > { %3040 = sst [smem:[#allocation10_spill]] %s2012_s18  ;;  %p237_p7 = scmp.eq.s32.totalorder %s1996_s13, 1 }
   0xe   : > { %p243_p8 = scmp.eq.s32.totalorder %s1568_s14, 1  ;;  %p1570_p9 = scmp.ge.s32.totalorder %s1914_s12, 2 }
   0xf   : > { %p1632_p10 = scmp.lt.s32.totalorder %s1914_s12, 2  ;;  %p2021_p11 = por %p237_p7, %p39_p0 }
  0x10   : > { %p2025_p12 = por %p243_p8, %p45_p3  ;;  %s287_s22 = sand.u32 1, %s1910_s11  }
  0x11   : > { %s1617_s23 = smul.u32 20, %s1914_s12  ;;  %p2034_p13 = pnand %p1632_p10, %p41_p5 }
  0x12   : > { %s3043_s21 = scalar_select %p2025_p12, 1, 0 }
  0x13   : > { %s1616_s24 = smul.u32 20, %s287_s22  ;;  %s296_s27 = scalar_lea.hbm %s3018_s0, %s1617_s23 }
  0x14   : > { %3044 = sst [smem:[#allocation11_spill]] %s3043_s21  ;;  %s298_s29 = sshll.u32 %s296_s27, 4  ;;  %s299_s29 = int_to_ptr.hbm [resolvable:$true] %s298_s29 }
  0x15   : > { %s291_s14 = scalar_lea.vmem [#allocation2], %s1616_s24  ;;  %s288_s17 = scalar_lea.sflag [#allocation3], %s287_s22 }
  0x16   : > { %s300_s16 = sshll.u32 %s291_s14, 4  ;;  %s1818_s18 = sshra.s32 %s299_s29, 4  ;;  %s301_s16 = int_to_ptr.vmem [resolvable:$true] %s300_s16  ;;  %s1819_s18 = int_to_ptr.hbm [resolvable:$true] %s1818_s18 }
  0x17   : > { %s1820_s11 = scalar_lea.hbm %s1819_s18, 20  ;;  %p1822_p1 = pneg %p2034_p13 }
  0x18   : > { %p1821_p0 = scmp.ne.s32.totalorder %s1819_s18, %s1820_s11  ;;  %s1825_s26 = scalar_lea.hbm %s3018_s0, 40 }
  0x19   : > { %p1826_p4 = scmp.lt.s32.totalorder %s1819_s18, %s3018_s0  ;;  %p1827_p5 = scmp.lt.s32.totalorder %s1825_s26, %s1820_s11 }
  0x1a   : > { %p1823_p2 = pnand %p1822_p1, %p1821_p0 }
  0x1b   : > { %p1828_p7 = por %p1827_p5, %p1826_p4 }
  0x1c   : > { %p1824_p3 = pneg %p1823_p2 }
  0x1e   : > { %p1829_p8 = pnand %p1828_p7, %p1824_p3 }
  0x20   : > { %1832 = shalt.err (!%p1829_p8)
}
  0x21   : > { %1627 = dma.hbm_to_vmem [thread:$0]  (!%p2034_p13), %s299_s29, 320, %s301_s16, %s288_s17  }
  0x22   : > { %p1572_p10 = scmp.ge.s32.totalorder %s1914_s12, 1  ;;  %p305_p0 = scmp.lt.s32.totalorder %s1914_s12, 3 }
  0x24   : > { %p306_p1 = pnand %p1572_p10, %p305_p0 }
  0x25   : > { %s2051_s22 = sand.u32 (!%p306_p1), 1, %s1906_s10  }
  0x26   : > { %309 = sbr.rel (%p306_p1) target bundleno = 738 (0x2e2), region = 56  ;;  %s312_s15 = scalar_lea.sflag (!%p306_p1), [#allocation3], %s2051_s22 }
  0x27   : > { %s1618_s11 = smul.u32 (!%p306_p1), 20, %s2051_s22 }
  0x29   : > { %s315_s18 = scalar_lea.vmem (!%p306_p1), [#allocation2], %s1618_s11 }
  0x2b   : > { %1893 = dma.done.wait (%p2014_p6), %s312_s15, 320  }
  0x2c   : > { %1895 = vsyncadd (%p2014_p6), %s312_s15, 4294966976  ;;  %v2061_v0 = vld [vmem:[%s315_s18] sm:$0xff]  ;;  %v2063_v1 = vld [vmem:[%s315_s18 + $0x8] sm:$0xff]  ;;  %s1916_s19 = smov 33   ;;  %s1917_s21 = smov 32   ;;  %vm682_vm6 = vcmask 1043456  }
  0x2d   : > { %v2065_v2 = vld [vmem:[%s315_s18 + $0x10] sm:$0xf]  ;;  %357 = vst [vmem:[#allocation1] ss:$2 sm:$0xff] %v2061_v0  ;;  %s1918_s24 = smov 31   ;;  %s1919_s27 = smov 1  }
  0x2e   : > { %359 = vst [vmem:[#allocation1 + $0x10] ss:$2 sm:$0xff] %v2063_v1  ;;  %s1920_s28 = smov 127   ;;  %s1921_s29 = smov 97   ;;  %vm3032_vm9 = vcmask 293888  }
  0x2f   : > { %361 = vst [vmem:[#allocation1 + $0x20] ss:$2 sm:$0xff] %v2065_v2  ;;  %s1922_s14 = smov 96   ;;  %s1923_s16 = smov 95  }
  0x30   : > { %s1619_s25 = smul.u32 20, %s1996_s13  ;;  %s350_s18 = scalar_lea.vmem [#allocation5], %s1618_s11 }
  0x31   : > { %s1495_s17 = sshll.u32 %s350_s18, 4  ;;  %s1496_s17 = int_to_ptr.vmem [resolvable:$true] %s1495_s17 }
  0x32   : > { %s1493_s13 = scalar_lea.hbm %s3027_s9, %s1619_s25 }
  0x33   : > { %s1497_s23 = sshll.u32 %s1493_s13, 4  ;;  %s1498_s23 = int_to_ptr.hbm [resolvable:$true] %s1497_s23 }
  0x34   : > { %v363_v3 = vld.sshfl [vmem:[#allocation1 + $0x8] sm:$0xff pattern:$0x75316420]  ;;  %v362_v4 = vld.sshfl [vmem:[#allocation1] sm:$0xff pattern:$0x75316420] }
  0x35   : > { %v364_v5 = vld.sshfl [vmem:[#allocation1 + $0x10] sm:$0xff pattern:$0x75316420]  ;;  %v365_v6 = vld.sshfl [vmem:[#allocation1 + $0x18] sm:$0xff pattern:$0x75316420] }
  0x36   : > { %v1675_v7 = vpack.i.bf16 %v364_v5, %v363_v3  ;;  %392 = vst [vmem:[#allocation1 + $0x10] ss:$2 sm:$0xff] %v2063_v1  ;;  %v2071_v8 = vld.sshfl [vmem:[#allocation1 + $0x20] sm:$0xff pattern:$0x75316420]  ;;  %v1680_v9 = vpack.i.bf16 %v365_v6, %v362_v4 }
  0x37   : > { %390 = vst [vmem:[#allocation1] ss:$2 sm:$0xff] %v2061_v0 }
  0x38   : > { %1676 = vrot.lane.b32.xlu2 %v1675_v7, %s1916_s19  ;;  %394 = vst [vmem:[#allocation1 + $0x20] ss:$2 sm:$0xff] %v2065_v2 }
  0x3d   : > { %v397_v10 = vld.sshfl [vmem:[#allocation1 + $0x10] sm:$0xff pattern:$0x75316420]  ;;  %v398_v11 = vld.sshfl [vmem:[#allocation1 + $0x18] sm:$0xff pattern:$0x75316420] }
  0x3e   : > { %v395_v12 = vld.sshfl [vmem:[#allocation1] sm:$0xff pattern:$0x75316420]  ;;  %v396_v13 = vld.sshfl [vmem:[#allocation1 + $0x8] sm:$0xff pattern:$0x75316420] }
  0x3f   : > { %421 = vst [vmem:[#allocation1] ss:$2 sm:$0xff] %v2061_v0  ;;  %v1690_v14 = vpack.i.bf16 %v398_v11, %v395_v12  ;;  %v2077_v15 = vld.sshfl [vmem:[#allocation1 + $0x20] sm:$0xff pattern:$0x75316420]  ;;  %v1685_v16 = vpack.i.bf16 %v397_v10, %v396_v13  ;;  %v382_v12 = vlaneseq }
  0x40   : > { %1681 = vrot.lane.b32.xlu2 %v1680_v9, %s1916_s19  ;;  %423 = vst [vmem:[#allocation1 + $0x10] ss:$2 sm:$0xff] %v2063_v1 }
  0x41   : > { %1691 = vrot.lane.b32.xlu0 %v1690_v14, %s1917_s21  ;;  %425 = vst [vmem:[#allocation1 + $0x20] ss:$2 sm:$0xff] %v2065_v2  ;;  %v2168_v14 = vand.u32 127, %v382_v12 }
  0x43   : > { %vm3035_vm0 = vcmp.lt.s32.totalorder %v2168_v14, 32  ;;  %vm570_vm1 = vcmp.lt.s32.totalorder %v2168_v14, 96  ;;  %vm3034_vm2 = vcmp.lt.s32.totalorder %v2168_v14, 31  ;;  %vm3033_vm3 = vcmp.lt.s32.totalorder %v2168_v14, 33 }
  0x44   : > { %vm508_vm4 = vcmp.lt.s32.totalorder %v2168_v14, 127  ;;  %vm3036_vm5 = vcmp.lt.s32.totalorder %v2168_v14, 1  ;;  %vm3037_vm7 = vcmp.lt.s32.totalorder %v2168_v14, 97  ;;  %vm601_vm8 = vcmp.lt.s32.totalorder %v2168_v14, 95 }
  0x46   : > { %v426_v17 = vld.sshfl [vmem:[#allocation1] sm:$0xff pattern:$0x75316420]  ;;  %v427_v18 = vld.sshfl [vmem:[#allocation1 + $0x8] sm:$0xff pattern:$0x75316420] }
  0x47   : > { %v428_v19 = vld.sshfl [vmem:[#allocation1 + $0x10] sm:$0xff pattern:$0x75316420]  ;;  %v429_v20 = vld.sshfl [vmem:[#allocation1 + $0x18] sm:$0xff pattern:$0x75316420] }
  0x48   : > { %454 = vst [vmem:[#allocation1 + $0x10] ss:$2 sm:$0xff] %v2063_v1  ;;  %v1700_v21 = vpack.i.bf16 %v429_v20, %v426_v17  ;;  %1686 = vrot.lane.b32.xlu2 %v1685_v16, %s1917_s21  ;;  %v1695_v22 = vpack.i.bf16 %v428_v19, %v427_v18  ;;  %v2085_v23 = vld.sshfl [vmem:[#allocation1 + $0x20] sm:$0xff pattern:$0x75316420] }
  0x49   : > { %452 = vst [vmem:[#allocation1] ss:$2 sm:$0xff] %v2061_v0 }
  0x4a   : > { %1701 = vrot.lane.b32.xlu1 %v1700_v21, %s1918_s24  ;;  %1696 = vrot.lane.b32.xlu0 %v1695_v22, %s1918_s24  ;;  %456 = vst [vmem:[#allocation1 + $0x20] ss:$2 sm:$0xff] %v2065_v2 }
  0x4f   : > { %v459_v24 = vld.sshfl [vmem:[#allocation1 + $0x10] sm:$0xff pattern:$0x75316420]  ;;  %v460_v25 = vld.sshfl [vmem:[#allocation1 + $0x18] sm:$0xff pattern:$0x75316420] }
  0x50   : > { %v458_v26 = vld.sshfl [vmem:[#allocation1 + $0x8] sm:$0xff pattern:$0x75316420]  ;;  %v457_v27 = vld.sshfl [vmem:[#allocation1] sm:$0xff pattern:$0x75316420] }
  0x51   : > { %v1705_v28 = vpack.i.bf16 %v459_v24, %v458_v26  ;;  %485 = vst [vmem:[#allocation1 + $0x10] ss:$2 sm:$0xff] %v2063_v1  ;;  %v461_v29 = vld.sshfl [vmem:[#allocation1 + $0x20] sm:$0xff pattern:$0x75316420]  ;;  %v1710_v30 = vpack.i.bf16 %v460_v25, %v457_v27 }
  0x52   : > { %483 = vst [vmem:[#allocation1] ss:$2 sm:$0xff] %v2061_v0 }
  0x53   : > { %1706 = vrot.lane.b32.xlu1 %v1705_v28, %s1919_s27  ;;  %487 = vst [vmem:[#allocation1 + $0x20] ss:$2 sm:$0xff] %v2065_v2 }
  0x58   : > { %v490_v31 = vld.sshfl [vmem:[#allocation1 + $0x10] sm:$0xff pattern:$0x75316420]  ;;  %v491_v32 = vld.sshfl [vmem:[#allocation1 + $0x18] sm:$0xff pattern:$0x75316420] }
  0x59   : > { %516 = vst [vmem:[#allocation1 + $0x10] ss:$2 sm:$0xff] %v2063_v1  ;;  %v489_v33 = vld.sshfl [vmem:[#allocation1 + $0x8] sm:$0xff pattern:$0x75316420]  ;;  %v1715_v37 = vpack.i.bf16 %v491_v32, %v490_v31 }
  0x5a   : > { %v492_v34 = vld.sshfl [vmem:[#allocation1 + $0x20] sm:$0xff pattern:$0x75316420] }
  0x5b   : > { %v488_v35 = vld.sshfl [vmem:[#allocation1] sm:$0xff pattern:$0x75316420]  ;;  %1711 = vrot.lane.b32.xlu1 %v1710_v30, %s1919_s27  ;;  %518 = vst [vmem:[#allocation1 + $0x20] ss:$2 sm:$0xff] %v2065_v2  ;;  %v1720_v36 = vpack.i.bf16 %v492_v34, %v489_v33 }
  0x5c   : > { %514 = vst [vmem:[#allocation1] ss:$2 sm:$0xff] %v2061_v0 }
  0x5d   : > { %1721 = vrot.lane.b32.xlu2 %v1720_v36, %s1920_s28 }
  0x60   : > { %v521_v38 = vld.sshfl [vmem:[#allocation1 + $0x10] sm:$0xff pattern:$0x75316420]  ;;  %v522_v39 = vld.sshfl [vmem:[#allocation1 + $0x18] sm:$0xff pattern:$0x75316420] }
  0x61   : > { %v1725_v40 = vpack.i.bf16 %v522_v39, %v521_v38  ;;  %547 = vst [vmem:[#allocation1 + $0x10] ss:$2 sm:$0xff] %v2063_v1 }
  0x62   : > { %v523_v41 = vld.sshfl [vmem:[#allocation1 + $0x20] sm:$0xff pattern:$0x75316420] }
  0x63   : > { %v519_v42 = vld.sshfl [vmem:[#allocation1] sm:$0xff pattern:$0x75316420]  ;;  %v520_v43 = vld.sshfl [vmem:[#allocation1 + $0x8] sm:$0xff pattern:$0x75316420]  ;;  %1716 = vrot.lane.b32.xlu1 %v1715_v37, %s1920_s28 }
  0x64   : > { %549 = vst [vmem:[#allocation1 + $0x20] ss:$2 sm:$0xff] %v2065_v2  ;;  %v1730_v44 = vpack.i.bf16 %v523_v41, %v520_v43 }
  0x65   : > { %1726 = vrot.lane.b32.xlu2 %v1725_v40, %s1921_s29  ;;  %545 = vst [vmem:[#allocation1] ss:$2 sm:$0xff] %v2061_v0 }
  0x66   : > { %1731 = vrot.lane.b32.xlu0 %v1730_v44, %s1921_s29 }
  0x68   : > { %v552_v45 = vld.sshfl [vmem:[#allocation1 + $0x10] sm:$0xff pattern:$0x75316420]  ;;  %v553_v46 = vld.sshfl [vmem:[#allocation1 + $0x18] sm:$0xff pattern:$0x75316420] }
  0x69   : > { %578 = vst [vmem:[#allocation1 + $0x10] ss:$2 sm:$0xff] %v2063_v1  ;;  %v1735_v47 = vpack.i.bf16 %v553_v46, %v552_v45 }
  0x6b   : > { %v554_v48 = vld.sshfl [vmem:[#allocation1 + $0x20] sm:$0xff pattern:$0x75316420] }
  0x6c   : > { %v551_v49 = vld.sshfl [vmem:[#allocation1 + $0x8] sm:$0xff pattern:$0x75316420]  ;;  %580 = vst [vmem:[#allocation1 + $0x20] ss:$2 sm:$0xff] %v2065_v2 }
  0x6d   : > { %v1740_v50 = vpack.i.bf16 %v554_v48, %v551_v49  ;;  %v550_v51 = vld.sshfl [vmem:[#allocation1] sm:$0xff pattern:$0x75316420] }
  0x6e   : > { %1736 = vrot.lane.b32.xlu0 %v1735_v47, %s1922_s14  ;;  %576 = vst [vmem:[#allocation1] ss:$2 sm:$0xff] %v2061_v0 }
  0x6f   : > { %1741 = vrot.lane.b32.xlu2 %v1740_v50, %s1922_s14 }
  0x70   : > { %v584_v52 = vld.sshfl [vmem:[#allocation1 + $0x18] sm:$0xff pattern:$0x75316420]  ;;  %v583_v53 = vld.sshfl [vmem:[#allocation1 + $0x10] sm:$0xff pattern:$0x75316420] }
  0x71   : > { %597 = vrot.lane.b32.xlu1 %v584_v52, %s1923_s16  ;;  %639 = vst [vmem:[#allocation1 + $0x10] ss:$2 sm:$0xff] %v2063_v1 }
  0x73   : > { %v585_v54 = vld.sshfl [vmem:[#allocation1 + $0x20] sm:$0xff pattern:$0x75316420] }
  0x74   : > { %641 = vst [vmem:[#allocation1 + $0x20] ss:$2 sm:$0xff] %v2065_v2 }
  0x75   : > { %v582_v55 = vld.sshfl [vmem:[#allocation1 + $0x8] sm:$0xff pattern:$0x75316420]  ;;  %v581_v56 = vld.sshfl [vmem:[#allocation1] sm:$0xff pattern:$0x75316420] }
  0x76   : > { %560 = vrot.lane.b32.xlu0 %v550_v51, %s1922_s14  ;;  %637 = vst [vmem:[#allocation1] ss:$2 sm:$0xff] %v2061_v0 }
  0x77   : > { %498 = vrot.lane.b32.xlu2 %v488_v35, %s1920_s28 }
  0x78   : > { %v2139_v62 = vld.sshfl [vmem:[#allocation1 + $0x10] sm:$0xff pattern:$0x75316420]  ;;  %v2141_v63 = vld.sshfl [vmem:[#allocation1 + $0x18] sm:$0xff pattern:$0x75316420] }
  0x79   : > { %475 = vrot.lane.b32.xlu1 %v461_v29, %s1919_s27  ;;  %1450 = vst [vmem:[#allocation1 + $0x10] ss:$2 sm:$0xff] %v2063_v1 }
  0x7b   : > { %v2151_v6 = vld.sshfl [vmem:[#allocation1 + $0x20] sm:$0xff pattern:$0x75316420] }
  0x7c   : > { %1452 = vst [vmem:[#allocation1 + $0x20] ss:$2 sm:$0xff] %v2065_v2 }
  0x7d   : > { %v2146_v4 = vld.sshfl [vmem:[#allocation1 + $0x8] sm:$0xff pattern:$0x75316420]  ;;  %v2148_v5 = vld.sshfl [vmem:[#allocation1] sm:$0xff pattern:$0x75316420] }
  0x7e   : > { %595 = vrot.lane.b32.xlu0 %v583_v53, %s1923_s16  ;;  %1448 = vst [vmem:[#allocation1] ss:$2 sm:$0xff] %v2061_v0 }
  0x7f   : > { %413 = vrot.lane.b32.xlu2 %v2077_v15, %s1917_s21 }
  0x81   : > { %599 = vrot.lane.b32.xlu1 %v585_v54, %s1923_s16 }
  0x86   : > { %593 = vrot.lane.b32.xlu0 %v582_v55, %s1923_s16 }
  0x89   : > { %591 = vrot.lane.b32.xlu1 %v581_v56, %s1923_s16 }
  0x8e   : > { %529 = vrot.lane.b32.xlu0 %v519_v42, %s1921_s29 }
  0x91   : > { %380 = vrot.lane.b32.xlu1 %v2071_v8, %s1916_s19 }
  0x92   : > { %v2129_v57 = vpop.permute.xlu2 %1676 }
  0x93   : > { %v1679_v16 = vunpack.i.h.bf16 %v2129_v57  ;;  %v1678_v20 = vunpack.i.l.bf16 %v2129_v57 }
  0x95   : > { %v387_v34 = vsel %vm3033_vm3, %v1678_v20, %v1679_v16 }
  0x96   : > { %444 = vrot.lane.b32.xlu0 %v2085_v23, %s1918_s24 }
  0x9a   : > { %v2133_v59 = vpop.permute.xlu2 %1681 }
  0x9b   : > { %v1684_v21 = vunpack.i.h.bf16 %v2133_v59 }
  0xa2   : > { %v2144_v3 = vpop.permute.xlu2 %1686 }
  0xa3   : > { %v1689_v2 = vunpack.i.h.bf16 %v2144_v3  ;;  %v1688_v15 = vunpack.i.l.bf16 %v2144_v3 }
  0xa5   : > { %v2187_v22 = vsel %vm3035_vm0, %v1688_v15, %v1689_v2 }
  0xa6   : > { %v614_v31 = vrot.slane %v2187_v22, 4 }
  0xb3   : > { %v2135_v60 = vpop.permute.xlu0 %1691 }
  0xb4   : > { %v1694_v33 = vunpack.i.h.bf16 %v2135_v60  ;;  %v1693_v52 = vunpack.i.l.bf16 %v2135_v60 }
  0xb7   : > { %v2158_v9 = vpop.permute.xlu2 %1721 }
  0xb8   : > { %v1724_v32 = vunpack.i.h.bf16 %v2158_v9  ;;  %v1723_v51 = vunpack.i.l.bf16 %v2158_v9 }
  0xbc   : > { %v2131_v58 = vpop.permute.xlu1 %1701  ;;  %v2154_v7 = vpop.permute.xlu0 %1696 }
  0xbd   : > { %v1699_v38 = vunpack.i.h.bf16 %v2154_v7  ;;  %v1698_v43 = vunpack.i.l.bf16 %v2154_v7 }
  0xbf   : > { %v2164_v11 = vpop.permute.xlu2 %1726  ;;  %v449_v53 = vsel %vm3034_vm2, %v1698_v43, %v1699_v38 }
  0xc0   : > { %v1729_v35 = vunpack.i.h.bf16 %v2164_v11  ;;  %v1728_v36 = vunpack.i.l.bf16 %v2164_v11 }
  0xc2   : > { %v541_v45 = vsel %vm3037_vm7, %v1728_v36, %v1729_v35 }
  0xc5   : > { %v2137_v61 = vpop.permute.xlu1 %1706 }
  0xc6   : > { %v1709_v28 = vunpack.i.h.bf16 %v2137_v61  ;;  %v1708_v29 = vunpack.i.l.bf16 %v2137_v61 }
  0xc8   : > { %v480_v46 = vsel %vm3036_vm5, %v1708_v29, %v1709_v28 }
  0xc9   : > { %v2189_v23 = vpop.permute.xlu2 %1741 }
  0xca   : > { %v1744_v26 = vunpack.i.h.bf16 %v2189_v23  ;;  %v1743_v42 = vunpack.i.l.bf16 %v2189_v23 }
  0xcd   : > { %v2156_v8 = vpop.permute.xlu1 %1711 }
  0xce   : > { %v1714_v39 = vunpack.i.h.bf16 %v2156_v8 }
  0xd0   : > { %v479_v12 = vsel %vm3036_vm5, %v1709_v28, %v1714_v39 }
  0xd5   : > { %v2162_v1 = vpop.permute.xlu1 %1716 }
  0xd6   : > { %v1719_v24 = vunpack.i.h.bf16 %v2162_v1  ;;  %v1718_v25 = vunpack.i.l.bf16 %v2162_v1  ;;  %v629_v1 = vrot.slane %v480_v46, 4 }
  0xd8   : > { %v2160_v10 = vpop.permute.xlu0 %1731  ;;  %v510_v37 = vsel %vm508_vm4, %v1718_v25, %v1719_v24  ;;  %v509_v50 = vsel %vm508_vm4, %v1719_v24, %v1724_v32  ;;  %v2303_v46 = vsel %vm682_vm6, %v449_v53, %v629_v1 }
  0xd9   : > { %v1734_v47 = vunpack.i.h.bf16 %v2160_v10  ;;  %v659_v49 = vrot.slane %v510_v37, 4  ;;  %v660_v24 = vrot.slane %v509_v50, 4  ;;  %v1704_v37 = vunpack.i.h.bf16 %v2131_v58 }
  0xda   : > { %v386_v50 = vsel %vm3033_vm3, %v1679_v16, %v1684_v21 }
  0xdb   : > { %v2275_v28 = vsel %vm682_vm6, %v2139_v62, %v659_v49  ;;  %v830_v62 = vld [vmem:[%s3022_s4] sm:$0xf]  ;;  %v2318_v53 = vsel %vm682_vm6, %v2141_v63, %v660_v24  ;;  %v448_v61 = vsel %vm3034_vm2, %v1699_v38, %v1704_v37  ;;  %v419_v38 = vsel %vm3035_vm0, %v1693_v52, %v1688_v15 }
  0xe0   : > { %v2166_v13 = vpop.permute.xlu0 %1736 }
  0xe1   : > { %v1739_v17 = vunpack.i.h.bf16 %v2166_v13  ;;  %v1738_v18 = vunpack.i.l.bf16 %v2166_v13  ;;  %v1713_v13 = vunpack.i.l.bf16 %v2156_v8 }
  0xe3   : > { %v598_v0 = vpop.permute.xlu1 %597  ;;  %v572_v30 = vsel %vm570_vm1, %v1738_v18, %v1739_v17  ;;  %v571_v41 = vsel %vm570_vm1, %v1739_v17, %v1744_v26  ;;  %v573_v22 = vsel %vm570_vm1, %v1743_v42, %v1738_v18  ;;  %v417_v18 = vsel %vm3035_vm0, %v1689_v2, %v1694_v33 }
  0xe4   : > { %v674_v40 = vrot.slane %v572_v30, 4  ;;  %v675_v54 = vrot.slane %v571_v41, 4  ;;  %v1924_v30 = vmov 0   ;;  %v1683_v2 = vunpack.i.l.bf16 %v2133_v59 }
  0xe5   : > { %1746 = vset.pattern.permute.xlu0 %v1924_v30  ;;  %1745 = vset.pattern.permute.xlu2 %v1924_v30  ;;  %v673_v49 = vrot.slane %v573_v22, 4  ;;  %v615_v1 = vrot.slane %v417_v18, 4  ;;  %v944_v59 = vadd.s32 128, %v2168_v14 }
  0xe6   : > { %v2253_v55 = vsel %vm682_vm6, %v541_v45, %v674_v40  ;;  %v1733_v40 = vunpack.i.l.bf16 %v2160_v10  ;;  %v511_v45 = vsel %vm508_vm4, %v1723_v51, %v1718_v25  ;;  %833 = vperm.xlu0 %1746, %v830_v62   ;;  %1817 = vset.pattern.permute.xlu1 %v1924_v30  ;;  %v613_v62 = vrot.slane %v419_v38, 4 }
  0xe7   : > { %v658_v63 = vrot.slane %v511_v45, 4  ;;  %v2364_v3 = vsel %vm682_vm6, %v386_v50, %v615_v1 }
  0xe8   : > { %v2176_v19 = vpop.permute.xlu0 %560 }
  0xe9   : > { %v694_v18 = vsel %vm682_vm6, %v2146_v4, %v658_v63  ;;  %v388_v4 = vsel %vm3033_vm3, %v1683_v2, %v1678_v20 }
  0xeb   : > { %v2198_v27 = vpop.permute.xlu1 %475 }
  0xec   : > { %v482_v50 = vsel %vm3036_vm5, %v2198_v27, %v1713_v13  ;;  %v478_v10 = vsel %vm3036_vm5, %v1714_v39, %v2198_v27 }
  0xed   : > { %v631_v27 = vrot.slane %v478_v10, 4 }
  0xf0   : > { %v596_v44 = vpop.permute.xlu0 %595 }
  0xf1   : > { %v2238_v48 = vsel %vm601_vm8, %v596_v44, %v598_v0 }
  0xf2   : > { %1577 = vmatpush.msk.msra.mxu2 %vm682_vm6, %v2238_v48 }
  0xf3   : > { %v2255_v56 = vpop.permute.xlu1 %599 }
  0xf4   : > { %781 = vmatpush.msra.mxu2 %v2253_v55  ;;  %v2266_v17 = vsel %vm601_vm8, %v598_v0, %v2255_v56  ;;  %v540_v0 = vsel %vm3037_vm7, %v1729_v35, %v1734_v47  ;;  %v630_v35 = vrot.slane %v479_v12, 4  ;;  %v481_v12 = vsel %vm3036_vm5, %v1713_v13, %v1708_v29  ;;  %v2339_v29 = vpop.permute.xlu2 %498 }
  0xf5   : > { %1579 = vmatpush.msk.msra.mxu3 %vm682_vm6, %v2266_v17  ;;  %v2295_v41 = vsel %vm682_vm6, %v540_v0, %v675_v54  ;;  %v2314_v54 = vsel %vm682_vm6, %v387_v34, %v614_v31  ;;  %v2331_v31 = vld [vmem:[%s3019_s1] sm:$0xf]  ;;  %v1703_v34 = vunpack.i.l.bf16 %v2131_v58  ;;  %v628_v30 = vrot.slane %v481_v12, 4 }
  0xf6   : > { %782 = vmatpush.msra.mxu2 %v2275_v28  ;;  %v2348_v22 = vsel %vm682_vm6, %v448_v61, %v630_v35  ;;  %v574_v0 = vsel %vm570_vm1, %v2176_v19, %v1743_v42 }
  0xf7   : > { %801 = vmatpush.msra.mxu3 %v2295_v41  ;;  %v672_v7 = vrot.slane %v574_v0, 4 }
  0xf8   : > { %783 = vmatpush.msra.mxu2 %v2303_v46  ;;  %v594_v25 = vpop.permute.xlu0 %593 }
  0xf9   : > { %v604_v16 = vsel %vm601_vm8, %v594_v25, %v596_v44  ;;  %802 = vmatpush.msra.mxu3 %v2318_v53  ;;  %v542_v44 = vsel %vm3037_vm7, %v1733_v40, %v1728_v36  ;;  %v512_v36 = vsel %vm508_vm4, %v2339_v29, %v1723_v51  ;;  %v450_v51 = vsel %vm3034_vm2, %v1703_v34, %v1698_v43 }
  0xfa   : > { %1575 = vmatpush.msk.msra.mxu1 %vm682_vm6, %v604_v16  ;;  %784 = vmatpush.msra.mxu2 %v2314_v54  ;;  %v699_v24 = vsel %vm682_vm6, %v542_v44, %v673_v49  ;;  %v689_v42 = vsel %vm682_vm6, %v450_v51, %v628_v30  ;;  %v657_v35 = vrot.slane %v512_v36, 4  ;;  %v684_v43 = vsel %vm682_vm6, %v388_v4, %v613_v62 }
  0xfb   : > { %803 = vmatpush.msra.mxu3 %v2348_v22  ;;  %v2359_v11 = vpop.permute.xlu1 %591  ;;  %1578 = vmatmul.msk.f32.vlgmr.msra.gmra.mxu2 %vm3032_vm9, %v2331_v31  ;;  %v947_v30 = vadd.s32 512, %v2168_v14 }
  0xfc   : > { %1585 = vmatpush.msk.msrb.mxu2 %vm682_vm6, %v604_v16  ;;  %761 = vmatpush.msra.mxu1 %v699_v24  ;;  %v605_v15 = vsel %vm601_vm8, %v2359_v11, %v594_v25  ;;  %v414_v49 = vpop.permute.xlu2 %413 }
  0xfd   : > { %804 = vmatpush.msra.mxu3 %v2364_v3  ;;  %1573 = vmatpush.msk.msra.mxu0 %vm682_vm6, %v605_v15  ;;  %v416_v8 = vsel %vm3035_vm0, %v1694_v33, %v414_v49 }
  0xfe   : > { %871 = vmatpush.msrb.mxu2 %v699_v24  ;;  %762 = vmatpush.msra.mxu1 %v694_v18  ;;  %v616_v60 = vrot.slane %v416_v8, 4 }
  0xff   : > { %1587 = vmatpush.msk.msrb.mxu3 %vm682_vm6, %v2238_v48  ;;  %v2408_v48 = vld [vmem:[%s3020_s2] sm:$0xf] }
 0x100   : > { %872 = vmatpush.msrb.mxu2 %v694_v18  ;;  %v530_v45 = vpop.permute.xlu0 %529  ;;  %763 = vmatpush.msra.mxu1 %v689_v42 }
 0x101   : > { %1580 = vmatmul.msk.f32.vlgmr.msra.gmra.mxu3 %vm3032_vm9, %v2331_v31  ;;  %v543_v57 = vsel %vm3037_vm7, %v530_v45, %v1733_v40  ;;  %v693_v40 = vsel %vm682_vm6, %v2148_v5, %v657_v35  ;;  %v420_v5 = vsel %vm3035_vm0, %v414_v49, %v1693_v52  ;;  %v513_v52 = vsel %vm508_vm4, %v1724_v32, %v2339_v29 }
 0x102   : > { %873 = vmatpush.msrb.mxu2 %v689_v42  ;;  %891 = vmatpush.msrb.mxu3 %v2253_v55  ;;  %v698_v20 = vsel %vm682_vm6, %v543_v57, %v672_v7  ;;  %v704_v55 = vld [vmem:[%s3021_s3] sm:$0xf]  ;;  %v544_v16 = vsel %vm3037_vm7, %v1734_v47, %v530_v45  ;;  %v661_v61 = vrot.slane %v513_v52, 4  ;;  %v952_v45 = vshra.s32 %v947_v30, 5 }
 0x103   : > { %764 = vmatpush.msra.mxu1 %v684_v43  ;;  %741 = vmatpush.msra.mxu0 %v698_v20  ;;  %v381_v25 = vpop.permute.xlu1 %380 }
 0x104   : > { %874 = vmatpush.msrb.mxu2 %v684_v43  ;;  %892 = vmatpush.msrb.mxu3 %v2275_v28  ;;  %v627_v28 = vrot.slane %v482_v50, 4  ;;  %v389_v1 = vsel %vm3033_vm3, %v381_v25, %v1683_v2  ;;  %v575_v2 = vsel %vm570_vm1, %v1744_v26, %v2176_v19  ;;  %v606_v19 = vsel %vm601_vm8, %v2255_v56, %v2359_v11 }
 0x105   : > { %1583 = vmatpush.msk.msrb.mxu1 %vm682_vm6, %v605_v15  ;;  %1586 = vmatmul.msk.f32.vlgmr.msrb.gmra.mxu2 %vm3032_vm9, %v2408_v48  ;;  %v676_v32 = vrot.slane %v575_v2, 4  ;;  %v697_v39 = vsel %vm682_vm6, %v2151_v6, %v661_v61  ;;  %v385_v47 = vsel %vm3033_vm3, %v1684_v21, %v381_v25  ;;  %v949_v21 = vshra.s32 %v944_v59, 5 }
 0x106   : > { %742 = vmatpush.msra.mxu0 %v693_v40  ;;  %893 = vmatpush.msrb.mxu3 %v2303_v46  ;;  %v687_v58 = vsel %vm682_vm6, %v385_v47, %v616_v60  ;;  %v948_v56 = vshra.s32 %v2168_v14, 5 }
 0x107   : > { %851 = vmatpush.msrb.mxu1 %v698_v20  ;;  %707 = vperm.xlu2 %1745, %v704_v55   ;;  %v702_v23 = vsel %vm682_vm6, %v544_v16, %v676_v32  ;;  %vm2504_vm10 = vcmp.ge.s32.totalorder %v949_v21, 2  ;;  %vm2508_vm11 = vcmp.lt.s32.totalorder %v949_v21, 18 }
 0x108   : > { %1576 = vmatmul.msk.f32.vlgmr.msra.gmra.mxu1 %vm3032_vm9, %v2331_v31  ;;  %v445_v13 = vpop.permute.xlu0 %444  ;;  %894 = vmatpush.msrb.mxu3 %v2314_v54  ;;  %v612_v54 = vrot.slane %v420_v5, 4  ;;  %vm2513_vm12 = vcmp.ge.s32.totalorder %v948_v56, 2  ;;  %vm2517_vm13 = vcmp.lt.s32.totalorder %v948_v56, 18  ;;  %vm969_vm14 = vmand %vm2504_vm10, %vm2508_vm11 }
 0x109   : > { %852 = vmatpush.msrb.mxu1 %v693_v40  ;;  %v451_v46 = vsel %vm3034_vm2, %v445_v13, %v1703_v34  ;;  %1588 = vmatmul.msk.f32.vlgmr.msrb.gmra.mxu3 %vm3032_vm9, %v2408_v48  ;;  %v447_v26 = vsel %vm3034_vm2, %v1704_v37, %v445_v13  ;;  %v954_v37 = vand.u32 31, %v944_v59  ;;  %v957_v40 = vand.u32 31, %v947_v30 }
 0x10a   : > { %v688_v12 = vsel %vm682_vm6, %v451_v46, %v627_v28  ;;  %v683_v9 = vsel %vm682_vm6, %v389_v1, %v612_v54  ;;  %v692_v33 = vsel %vm682_vm6, %v447_v26, %v631_v27 }
 0x10b   : > { %743 = vmatpush.msra.mxu0 %v688_v12  ;;  %853 = vmatpush.msrb.mxu1 %v688_v12  ;;  %vm974_vm15 = vcmp.ge.s32.totalorder %v954_v37, 2  ;;  %vm2542_vm10 = vcmp.lt.s32.totalorder %v954_v37, 18  ;;  %vm987_vm0 = vcmp.lt.s32.totalorder %v957_v40, 18 }
 0x10c   : > { %vm2538_vm2 = vmand %vm969_vm14, %vm974_vm15  ;;  %vm2581_vm15 = vcmp.lt.s32.totalorder %v952_v45, 18 }
 0x10d   : > { %744 = vmatpush.msra.mxu0 %v683_v9  ;;  %854 = vmatpush.msrb.mxu1 %v683_v9  ;;  %v946_v9 = vadd.s32 384, %v2168_v14 }
 0x10e   : > { %1574 = vmatmul.msk.f32.vlgmr.msra.gmra.mxu0 %vm3032_vm9, %v2331_v31 }
 0x10f   : > { %1591 = vmatpush.msk.msra.mxu1 %vm682_vm6, %v606_v19  ;;  %1581 = vmatpush.msk.msrb.mxu0 %vm682_vm6, %v606_v19  ;;  %v951_v19 = vshra.s32 %v946_v9, 5  ;;  %v956_v10 = vand.u32 31, %v946_v9 }
 0x110   : > { %1584 = vmatmul.msk.f32.vlgmr.msrb.gmra.mxu1 %vm3032_vm9, %v2408_v48 }
 0x111   : > { %931 = vmatpush.msra.mxu1 %v702_v23  ;;  %821 = vmatpush.msrb.mxu0 %v702_v23 }
 0x113   : > { %932 = vmatpush.msra.mxu1 %v697_v39  ;;  %822 = vmatpush.msrb.mxu0 %v697_v39 }
 0x115   : > { %933 = vmatpush.msra.mxu1 %v692_v33  ;;  %823 = vmatpush.msrb.mxu0 %v692_v33 }
 0x117   : > { %934 = vmatpush.msra.mxu1 %v687_v58  ;;  %824 = vmatpush.msrb.mxu0 %v687_v58  ;;  %v1334_v58 = vld [vmem:[%s3026_s8] sm:$0xf] }
 0x118   : > { %1592 = vmatmul.msk.f32.vlgmr.msra.gmra.mxu1 %vm3032_vm9, %v2408_v48  ;;  %1582 = vmatmul.msk.f32.vlgmr.msrb.gmra.mxu0 %vm3032_vm9, %v2331_v31 }
 0x119   : > { %1589 = vmatpush.msk.msra.mxu0 %vm682_vm6, %v2266_v17 }
 0x11b   : > { %911 = vmatpush.msra.mxu0 %v2295_v41 }
 0x11d   : > { %912 = vmatpush.msra.mxu0 %v2318_v53  ;;  %v953_v53 = vand.u32 31, %v2168_v14 }
 0x11f   : > { %913 = vmatpush.msra.mxu0 %v2348_v22  ;;  %v945_v22 = vadd.s32 256, %v2168_v14  ;;  %vm973_vm3 = vcmp.ge.s32.totalorder %v953_v53, 2 }
 0x121   : > { %914 = vmatpush.msra.mxu0 %v2364_v3  ;;  %v950_v51 = vshra.s32 %v945_v22, 5  ;;  %v955_v57 = vand.u32 31, %v945_v22 }
 0x122   : > { %1590 = vmatmul.msk.f32.vlgmr.msra.gmra.mxu0 %vm3032_vm9, %v2408_v48  ;;  %vm968_vm9 = vmand %vm2513_vm12, %vm2517_vm13  ;;  %vm2551_vm12 = vcmp.lt.s32.totalorder %v953_v53, 18 }
 0x123   : > { %vm2547_vm11 = vmand %vm968_vm9, %vm973_vm3  ;;  %vm2565_vm9 = vcmp.ge.s32.totalorder %v950_v51, 2  ;;  %vm2569_vm14 = vcmp.lt.s32.totalorder %v950_v51, 18 }
 0x124   : > { %vm989_vm13 = vmand %vm2538_vm2, %vm2542_vm10  ;;  %vm2577_vm2 = vcmp.ge.s32.totalorder %v952_v45, 2 }
 0x125   : > { %vm988_vm3 = vmand %vm2547_vm11, %vm2551_vm12  ;;  %vm975_vm11 = vcmp.ge.s32.totalorder %v955_v57, 2 }
 0x126   : > { %vm970_vm10 = vmand %vm2565_vm9, %vm2569_vm14  ;;  %vm985_vm9 = vcmp.lt.s32.totalorder %v955_v57, 18 }
 0x127   : > { %vm972_vm12 = vmand %vm2577_vm2, %vm2581_vm15  ;;  %vm961_vm2 = vcmp.ge.s32.totalorder %v951_v19, 2  ;;  %vm966_vm15 = vcmp.lt.s32.totalorder %v951_v19, 18 }
 0x158   : > { %v2523_v44 = vpop.permute.xlu0 %833 }
 0x161   : > { %v2530_v38 = vpop.permute.xlu2 %707 }
 0x17e   : > { %v786_v6 = vpop.f32.mrf.mxu2 }
 0x17f   : > { %v787_v46 = vadd.f32 %v786_v6, %v2530_v38 }
 0x184   : > { %v2521_v29 = vpop.f32.mrf.mxu3 }
 0x185   : > { %v766_v31 = vpop.f32.mrf.mxu1  ;;  %v807_v39 = vadd.f32 %v2521_v29, %v2530_v38 }
 0x186   : > { %v767_v36 = vadd.f32 %v766_v31, %v2530_v38 }
 0x188   : > { %v876_v24 = vpop.f32.mrf.mxu2 }
 0x189   : > { %v877_v11 = vadd.f32 %v876_v24, %v2523_v44 }
 0x18b   : > { %v746_v0 = vpop.f32.mrf.mxu0  ;;  %v940_v35 = vmax.f32 %v767_v36, %v877_v11 }
 0x18c   : > { %v747_v4 = vadd.f32 %v746_v0, %v2530_v38  ;;  %v896_v49 = vpop.f32.mrf.mxu3 }
 0x18d   : > { %v856_v42 = vpop.f32.mrf.mxu1  ;;  %v2573_v55 = vsel %vm989_vm13, %v940_v35, 0.0  ;;  %v897_v13 = vadd.f32 %v896_v49, %v2523_v44  ;;  %vm977_vm13 = vcmp.ge.s32.totalorder %v957_v40, 2 }
 0x18e   : > { %v857_v7 = vadd.f32 %v856_v42, %v2523_v44  ;;  %vm982_vm14 = vmand %vm972_vm12, %vm977_vm13  ;;  %vm3070_vm12 = vcmp.lt.s32.totalorder %v2168_v14, 97 }
 0x18f   : > { %v941_v12 = vmax.f32 %v787_v46, %v897_v13  ;;  %vm992_vm7 = vmand %vm982_vm14, %vm987_vm0  ;;  %vm3074_vm14 = vcmp.lt.s32.totalorder %v2168_v14, 32 }
 0x190   : > { %v939_v43 = vmax.f32 %v747_v4, %v857_v7  ;;  %vm971_vm0 = vmand %vm961_vm2, %vm966_vm15  ;;  %vm3075_vm2 = vcmp.lt.s32.totalorder %v2168_v14, 31 }
 0x191   : > { %vm3071_vm13 = vmmov %vm3070_vm12 }
 0x192   : > { %v2575_v50 = vsel %vm988_vm3, %v939_v43, 0.0  ;;  %vm980_vm3 = vmand %vm970_vm10, %vm975_vm11  ;;  %vm986_vm10 = vcmp.lt.s32.totalorder %v956_v10, 18 }
 0x193   : > { %1113 = vrot.lane.b32.xlu2 %v2575_v50, %s1923_s16  ;;  %v1757_v28 = vpack.i.bf16 %v2573_v55, %v2575_v50  ;;  %vm990_vm5 = vmand %vm980_vm3, %vm985_vm9  ;;  %vm3072_vm3 = vcmp.lt.s32.totalorder %v2168_v14, 1 }
 0x194   : > { %v2605_v61 = vsel %vm990_vm5, %v941_v12, 0.0  ;;  %vm976_vm5 = vcmp.ge.s32.totalorder %v956_v10, 2  ;;  %vm3073_vm9 = vmmov %vm3072_vm3 }
 0x195   : > { %1758 = vrot.lane.b32.xlu0 %v1757_v28, %s1921_s29  ;;  %1748 = vrot.lane.b32.xlu1 %v1757_v28, %s1922_s14  ;;  %v936_v1 = vpop.f32.mrf.mxu1  ;;  %v826_v52 = vpop.f32.mrf.mxu0  ;;  %vm3076_vm15 = vmmov %vm3075_vm2 }
 0x196   : > { %v937_v54 = vadd.f32 %v936_v1, %v2523_v44  ;;  %v827_v2 = vadd.f32 %v826_v52, %v2530_v38 }
 0x198   : > { %v943_v16 = vmax.f32 %v827_v2, %v937_v54 }
 0x19a   : > { %v2611_v32 = vsel %vm992_vm7, %v943_v16, 0.0  ;;  %vm981_vm7 = vmand %vm971_vm0, %vm976_vm5  ;;  %vm3077_vm0 = vcmp.lt.s32.totalorder %v2168_v14, 33  ;;  %vm3078_vm5 = vcmask 293888  }
 0x19b   : > { %1753 = vrot.lane.b32.xlu2 %v1757_v28, %s1920_s28  ;;  %v1767_v23 = vpack.i.bf16 %v2611_v32, %v2575_v50  ;;  %v1762_v26 = vpack.i.bf16 %v2611_v32, %v2605_v61  ;;  %vm991_vm11 = vmand %vm981_vm7, %vm986_vm10 }
 0x19c   : > { %vm3079_vm7 = vmmov %vm3072_vm3 }
 0x19d   : > { %1117 = vrot.lane.b32.xlu0 %v2605_v61, %s1923_s16  ;;  %1115 = vrot.lane.b32.xlu1 %v2573_v55, %s1923_s16  ;;  %vm3080_vm10 = vmmov %vm3070_vm12 }
 0x19f   : > { %v916_v8 = vpop.f32.mrf.mxu0 }
 0x1a0   : > { %v917_v27 = vadd.f32 %v916_v8, %v2523_v44 }
 0x1a2   : > { %v942_v47 = vmax.f32 %v807_v39, %v917_v27 }
 0x1a3   : > { %1768 = vrot.lane.b32.xlu2 %v1767_v23, %s1919_s27 }
 0x1a4   : > { %v2627_v60 = vsel %vm991_vm11, %v942_v47, 0.0  ;;  %vm3081_vm11 = vmmov %vm3075_vm2 }
 0x1a5   : > { %1057 = vrot.lane.b32.xlu0 %v2605_v61, %s1919_s27  ;;  %1763 = vrot.lane.b32.xlu1 %v1762_v26, %s1922_s14  ;;  %v1792_v33 = vpack.i.bf16 %v2627_v60, %v2573_v55 }
 0x1ab   : > { %1778 = vrot.lane.b32.xlu2 %v1762_v26, %s1921_s29 }
 0x1ad   : > { %1783 = vrot.lane.b32.xlu0 %v1767_v23, %s1917_s21  ;;  %1773 = vrot.lane.b32.xlu1 %v1762_v26, %s1920_s28 }
 0x1b3   : > { %1793 = vrot.lane.b32.xlu2 %v1792_v33, %s1919_s27  ;;  %s1482_s27 = scalar_lea.sflag [#allocation4], %s2051_s22 }
 0x1b5   : > { %1798 = vrot.lane.b32.xlu0 %v1767_v23, %s1916_s19  ;;  %1788 = vrot.lane.b32.xlu1 %v1767_v23, %s1918_s24 }
 0x1bb   : > { %1808 = vrot.lane.b32.xlu2 %v1792_v33, %s1918_s24 }
 0x1bd   : > { %1121 = vrot.lane.b32.xlu0 %v2611_v32, %s1923_s16  ;;  %1803 = vrot.lane.b32.xlu1 %v1792_v33, %s1917_s21 }
 0x1c3   : > { %1104 = vrot.lane.b32.xlu2 %v2627_v60, %s1922_s14  ;;  %s1862_s14 = sshra.s32 %s1498_s23, 4  ;;  %s1863_s14 = int_to_ptr.hbm [resolvable:$true] %s1862_s14 }
 0x1c4   : > { %p1869_p3 = scmp.lt.s32.totalorder %s1863_s14, %s3027_s9 }
 0x1c5   : > { %1119 = vrot.lane.b32.xlu0 %v2627_v60, %s1923_s16  ;;  %1813 = vrot.lane.b32.xlu1 %v1792_v33, %s1916_s19 }
 0x1cb   : > { %1089 = vrot.lane.b32.xlu2 %v2627_v60, %s1921_s29 }
 0x1cd   : > { %1012 = vrot.lane.b32.xlu0 %v2605_v61, %s1916_s19  ;;  %1074 = vrot.lane.b32.xlu1 %v2627_v60, %s1920_s28  ;;  %s1864_s19 = scalar_lea.hbm %s1863_s14, 20 }
 0x1ce   : > { %p1865_p6 = scmp.ne.s32.totalorder %s1863_s14, %s1864_s19 }
 0x1d0   : > { %p1866_p13 = pnand %p1865_p6, %p2021_p11 }
 0x1d2   : > { %p1867_p2 = pneg %p1866_p13 }
 0x1d3   : > { %1042 = vrot.lane.b32.xlu2 %v2605_v61, %s1918_s24  ;;  %s1868_s24 = scalar_lea.hbm %s3027_s9, 40 }
 0x1d4   : > { %p1870_p4 = scmp.lt.s32.totalorder %s1868_s24, %s1864_s19 }
 0x1d5   : > { %1027 = vrot.lane.b32.xlu1 %v2605_v61, %s1917_s21 }
 0x1d6   : > { %p1871_p5 = por %p1870_p4, %p1869_p3 }
 0x1d8   : > { %p1872_p7 = pnand %p1871_p5, %p1867_p2 }
 0x1db   : > { %1337 = vperm.xlu2 %1745, %v1334_v58  }
 0x1ed   : > { %v2656_v59 = vpop.permute.xlu2 %1113 }
 0x1f5   : > { %v2658_v6 = vpop.permute.xlu2 %1753 }
 0x1f6   : > { %v1756_v41 = vunpack.i.h.bf16 %v2658_v6  ;;  %v1755_v53 = vunpack.i.l.bf16 %v2658_v6 }
 0x1f8   : > { %v1081_v29 = vsel %vm508_vm4, %v1755_v53, %v1756_v41 }
 0x1f9   : > { %v1163_v15 = vrot.slane %v1081_v29, 4 }
 0x1fb   : > { %v2708_v18 = vsel %vm682_vm6, %v2575_v50, %v1163_v15 }
 0x1fd   : > { %v2660_v21 = vpop.permute.xlu2 %1768 }
 0x1fe   : > { %v1771_v50 = vunpack.i.h.bf16 %v2660_v21  ;;  %v1770_v25 = vunpack.i.l.bf16 %v2660_v21 }
 0x200   : > { %v1067_v54 = vsel %vm3072_vm3, %v1771_v50, %v1770_v25 }
 0x201   : > { %v1148_v39 = vrot.slane %v1067_v54, 4 }
 0x205   : > { %v2674_v34 = vpop.permute.xlu2 %1778 }
 0x206   : > { %v1780_v35 = vunpack.i.l.bf16 %v2674_v34 }
 0x207   : > { %v2662_v56 = vpop.permute.xlu0 %1758  ;;  %v2664_v37 = vpop.permute.xlu1 %1748 }
 0x208   : > { %v1751_v31 = vunpack.i.h.bf16 %v2664_v37  ;;  %v1750_v17 = vunpack.i.l.bf16 %v2664_v37  ;;  %v1761_v44 = vunpack.i.h.bf16 %v2662_v56  ;;  %v1760_v22 = vunpack.i.l.bf16 %v2662_v56 }
 0x20a   : > { %v1111_v63 = vsel %vm570_vm1, %v1750_v17, %v1751_v31  ;;  %v1096_v36 = vsel %vm3070_vm12, %v1760_v22, %v1761_v44  ;;  %v1095_v57 = vsel %vm3071_vm13, %v1761_v44, %v1780_v35  ;;  %vm3082_vm12 = vmmov %vm3074_vm14 }
 0x20b   : > { %v1178_v38 = vrot.slane %v1111_v63, 4  ;;  %vm3083_vm13 = vmmov %vm3082_vm12 }
 0x20d   : > { %v2703_v0 = vsel %vm682_vm6, %v1096_v36, %v1178_v38  ;;  %v2711_v62 = vpop.permute.xlu2 %1793  ;;  %v2794_v38 = vld [vmem:[%s3023_s5] sm:$0xf]  ;;  %v1781_v36 = vunpack.i.h.bf16 %v2674_v34 }
 0x20e   : > { %v1795_v5 = vunpack.i.l.bf16 %v2711_v62  ;;  %v1796_v37 = vunpack.i.h.bf16 %v2711_v62 }
 0x20f   : > { %v2682_v24 = vpop.permute.xlu0 %1117  ;;  %v1116_v11 = vpop.permute.xlu1 %1115 }
 0x210   : > { %v2687_v30 = vsel %vm601_vm8, %v1116_v11, %v2682_v24  ;;  %v2692_v3 = vsel %vm601_vm8, %v2656_v59, %v1116_v11  ;;  %v1066_v2 = vsel %vm3073_vm9, %v1770_v25, %v1795_v5  ;;  %v1097_v25 = vsel %vm3080_vm10, %v1781_v36, %v1760_v22  ;;  %vm3087_vm9 = vmmov %vm3077_vm0 }
 0x211   : > { %1593 = vmatpush.msk.msra.mxu2 %vm682_vm6, %v2692_v3  ;;  %1595 = vmatpush.msk.msra.mxu3 %vm682_vm6, %v2687_v30  ;;  %v1149_v47 = vrot.slane %v1066_v2, 4 }
 0x213   : > { %1245 = vmatpush.msra.mxu2 %v2703_v0 }
 0x215   : > { %1246 = vmatpush.msra.mxu2 %v2708_v18  ;;  %v2735_v49 = vpop.permute.xlu2 %1808 }
 0x216   : > { %v1810_v12 = vunpack.i.l.bf16 %v2735_v49 }
 0x217   : > { %v2713_v51 = vpop.permute.xlu0 %1057  ;;  %v2715_v4 = vpop.permute.xlu1 %1763 }
 0x218   : > { %v1765_v42 = vunpack.i.l.bf16 %v2715_v4  ;;  %v1766_v16 = vunpack.i.h.bf16 %v2715_v4 }
 0x21a   : > { %v1110_v7 = vsel %vm570_vm1, %v1751_v31, %v1765_v42 }
 0x21b   : > { %v1179_v45 = vrot.slane %v1110_v7, 4 }
 0x21d   : > { %v2728_v43 = vsel %vm682_vm6, %v1095_v57, %v1179_v45  ;;  %v1105_v33 = vpop.permute.xlu2 %1104  ;;  %v1063_v57 = vsel %vm3079_vm7, %v1796_v37, %v1771_v50  ;;  %v1209_v50 = vld [vmem:[%s3025_s7] sm:$0xf] }
 0x21e   : > { %1265 = vmatpush.msra.mxu3 %v2728_v43  ;;  %1212 = vperm.xlu1 %1817, %v1209_v50   ;;  %v1108_v56 = vsel %vm570_vm1, %v1105_v33, %v1766_v16  ;;  %v1109_v22 = vsel %vm570_vm1, %v1765_v42, %v1105_v33 }
 0x21f   : > { %v2731_v20 = vpop.permute.xlu0 %1783  ;;  %v2733_v48 = vpop.permute.xlu1 %1773 }
 0x220   : > { %v1775_v40 = vunpack.i.l.bf16 %v2733_v48  ;;  %v1786_v13 = vunpack.i.h.bf16 %v2731_v20  ;;  %v1785_v1 = vunpack.i.l.bf16 %v2731_v20  ;;  %v1776_v27 = vunpack.i.h.bf16 %v2733_v48 }
 0x221   : > { %v1811_v20 = vunpack.i.h.bf16 %v2735_v49 }
 0x222   : > { %v1080_v28 = vsel %vm508_vm4, %v1756_v41, %v1775_v40  ;;  %v1037_v9 = vsel %vm3074_vm14, %v1786_v13, %v1785_v1  ;;  %v1112_v41 = vsel %vm570_vm1, %v1766_v16, %v1750_v17  ;;  %v1082_v17 = vsel %vm508_vm4, %v1776_v27, %v1755_v53  ;;  %vm3084_vm1 = vmmov %vm3080_vm10 }
 0x223   : > { %v1164_v46 = vrot.slane %v1080_v28, 4  ;;  %v1133_v44 = vrot.slane %v1037_v9, 4  ;;  %v1182_v15 = vrot.slane %v1112_v41, 4  ;;  %v1167_v53 = vrot.slane %v1082_v17, 4  ;;  %vm3085_vm3 = vmmov %vm3084_vm1 }
 0x224   : > { %v1180_v16 = vrot.slane %v1109_v22, 4  ;;  %vm3088_vm14 = vmmov %vm3078_vm5  ;;  %v1456_v22 = vld.sshfl [vmem:[#allocation1 + $0x18] sm:$0xff pattern:$0x75316420] }
 0x225   : > { %v2749_v52 = vsel %vm682_vm6, %v2573_v55, %v1164_v46  ;;  %v2831_v46 = vsel %vm682_vm6, %v1097_v25, %v1182_v15  ;;  %v1090_v2 = vpop.permute.xlu2 %1089  ;;  %v2847_v9 = vsel %vm682_vm6, %v2611_v32, %v1167_v53  ;;  %vm3095_vm10 = vmmov %vm3082_vm12 }
 0x226   : > { %1266 = vmatpush.msra.mxu3 %v2749_v52  ;;  %v1093_v32 = vsel %vm3084_vm1, %v1090_v2, %v1781_v36 }
 0x227   : > { %v2762_v19 = vpop.permute.xlu0 %1798  ;;  %v1789_v55 = vpop.permute.xlu1 %1788 }
 0x228   : > { %v1801_v10 = vunpack.i.h.bf16 %v2762_v19  ;;  %v1800_v23 = vunpack.i.l.bf16 %v2762_v19  ;;  %v1791_v8 = vunpack.i.h.bf16 %v1789_v55  ;;  %v1790_v26 = vunpack.i.l.bf16 %v1789_v55 }
 0x229   : > { %v1152_v55 = vrot.slane %v1063_v57, 4 }
 0x22a   : > { %v1052_v58 = vsel %vm3075_vm2, %v1791_v8, %v1790_v26  ;;  %v1051_v21 = vsel %vm3076_vm15, %v1790_v26, %v1810_v12  ;;  %v1022_v31 = vsel %vm3077_vm0, %v1801_v10, %v1800_v23  ;;  %v1048_v54 = vsel %vm3081_vm11, %v1811_v20, %v1791_v8  ;;  %vm3089_vm2 = vmmov %vm3078_vm5 }
 0x22b   : > { %v2784_v63 = vsel %vm682_vm6, %v1052_v58, %v1148_v39  ;;  %v2787_v29 = vsel %vm682_vm6, %v1051_v21, %v1149_v47  ;;  %v2804_v11 = vsel %vm682_vm6, %v1022_v31, %v1133_v44  ;;  %v2859_v42 = vsel %vm682_vm6, %v1048_v54, %v1152_v55  ;;  %vm3090_vm15 = vmmov %vm3079_vm7 }
 0x22c   : > { %1247 = vmatpush.msra.mxu2 %v2784_v63  ;;  %1267 = vmatpush.msra.mxu3 %v2787_v29  ;;  %v1181_v26 = vrot.slane %v1108_v56, 4  ;;  %v1094_v39 = vsel %vm3085_vm3, %v1780_v35, %v1090_v2  ;;  %vm3099_vm1 = vmmov %vm3089_vm2 }
 0x22d   : > { %v2883_v31 = vsel %vm682_vm6, %v1094_v39, %v1180_v16  ;;  %v1043_v19 = vpop.permute.xlu2 %1042  ;;  %vm3100_vm3 = vmmov %vm3099_vm1 }
 0x22e   : > { %1248 = vmatpush.msra.mxu2 %v2804_v11  ;;  %v1206_v41 = vsel %vm682_vm6, %v1093_v32, %v1181_v26 }
 0x22f   : > { %v1122_v7 = vpop.permute.xlu0 %1121  ;;  %v2808_v45 = vpop.permute.xlu1 %1803  ;;  %1594 = vmatmul.msk.f32.vlgmr.msra.gmra.mxu2 %vm3078_vm5, %v2794_v38  ;;  %vm3092_vm5 = vmmov %vm3081_vm11 }
 0x230   : > { %v2815_v6 = vsel %vm601_vm8, %v1122_v7, %v2656_v59  ;;  %v1806_v28 = vunpack.i.h.bf16 %v2808_v45  ;;  %v1805_v59 = vunpack.i.l.bf16 %v2808_v45  ;;  %v1049_v62 = vsel %vm3092_vm5, %v1043_v19, %v1811_v20  ;;  %vm3096_vm11 = vmmov %vm3095_vm10 }
 0x231   : > { %1601 = vmatpush.msk.msrb.mxu2 %vm682_vm6, %v2815_v6 }
 0x232   : > { %v1033_v8 = vsel %vm3082_vm12, %v1806_v28, %v1786_v13  ;;  %v1036_v4 = vsel %vm3083_vm13, %v1785_v1, %v1805_v59 }
 0x233   : > { %1325 = vmatpush.msrb.mxu2 %v2831_v46  ;;  %v1134_v35 = vrot.slane %v1036_v4, 4  ;;  %v1137_v21 = vrot.slane %v1033_v8, 4 }
 0x235   : > { %1326 = vmatpush.msrb.mxu2 %v2847_v9 }
 0x237   : > { %v1120_v47 = vpop.permute.xlu0 %1119  ;;  %v2867_v13 = vpop.permute.xlu1 %1813  ;;  %1327 = vmatpush.msrb.mxu2 %v2859_v42 }
 0x238   : > { %v1123_v1 = vsel %vm601_vm8, %v1120_v47, %v1122_v7  ;;  %v2875_v33 = vsel %vm601_vm8, %v2682_v24, %v1120_v47  ;;  %v1816_v58 = vunpack.i.h.bf16 %v2867_v13  ;;  %v1815_v34 = vunpack.i.l.bf16 %v2867_v13  ;;  %vm3086_vm8 = vmmov %vm3077_vm0  ;;  %v1457_v13 = vld.sshfl [vmem:[#allocation1 + $0x20] sm:$0xff pattern:$0x75316420] }
 0x239   : > { %1597 = vmatpush.msk.msrb.mxu0 %vm682_vm6, %v2875_v33  ;;  %1599 = vmatpush.msk.msrb.mxu1 %vm682_vm6, %v1123_v1  ;;  %vm3091_vm0 = vmmov %vm3079_vm7 }
 0x23a   : > { %v1021_v24 = vsel %vm3086_vm8, %v1800_v23, %v1815_v34  ;;  %v1018_v44 = vsel %vm3087_vm9, %v1816_v58, %v1801_v10  ;;  %v1064_v23 = vsel %vm3090_vm15, %v2713_v51, %v1796_v37  ;;  %vm3093_vm7 = vmmov %vm3092_vm5 }
 0x23b   : > { %1285 = vmatpush.msrb.mxu0 %v2883_v31  ;;  %1305 = vmatpush.msrb.mxu1 %v1206_v41  ;;  %v2896_v17 = vsel %vm682_vm6, %v1021_v24, %v1134_v35  ;;  %v1192_v15 = vsel %vm682_vm6, %v1018_v44, %v1137_v21  ;;  %v1151_v37 = vrot.slane %v1064_v23, 4  ;;  %vm3097_vm12 = vmmov %vm3086_vm8  ;;  %v1455_v21 = vld.sshfl [vmem:[#allocation1 + $0x10] sm:$0xff pattern:$0x75316420] }
 0x23c   : > { %1268 = vmatpush.msra.mxu3 %v2896_v17  ;;  %1328 = vmatpush.msrb.mxu2 %v1192_v15  ;;  %vm3098_vm13 = vmmov %vm3086_vm8 }
 0x23d   : > { %1596 = vmatmul.msk.f32.vlgmr.msra.gmra.mxu3 %vm3088_vm14, %v2794_v38  ;;  %1602 = vmatmul.msk.f32.vlgmr.msrb.gmra.mxu2 %vm3089_vm2, %v2794_v38  ;;  %vm3101_vm8 = vmmov %vm3099_vm1 }
 0x23e   : > { %1603 = vmatpush.msk.msrb.mxu3 %vm682_vm6, %v2692_v3  ;;  %1609 = vmatpush.msk.msra.mxu2 %vm682_vm6, %v1123_v1  ;;  %v1065_v3 = vsel %vm3091_vm0, %v1795_v5, %v2713_v51  ;;  %v1050_v51 = vsel %vm3093_vm7, %v1810_v12, %v1043_v19  ;;  %v1196_v12 = vsel %vm682_vm6, %v1049_v62, %v1151_v37  ;;  %vm3102_vm9 = vmmov %vm3099_vm1  ;;  %v1454_v1 = vld.sshfl [vmem:[#allocation1 + $0x8] sm:$0xff pattern:$0x75316420] }
 0x23f   : > { %v1075_v10 = vpop.permute.xlu1 %1074  ;;  %v1150_v5 = vrot.slane %v1065_v3, 4  ;;  %vm3103_vm14 = vmmov %vm3099_vm1 }
 0x240   : > { %1355 = vmatpush.msrb.mxu3 %v2703_v0  ;;  %1415 = vmatpush.msra.mxu2 %v1206_v41  ;;  %v1078_v36 = vsel %vm508_vm4, %v1075_v10, %v1776_v27  ;;  %v1079_v0 = vsel %vm508_vm4, %v1775_v40, %v1075_v10  ;;  %v1013_v27 = vpop.permute.xlu0 %1012  ;;  %vm3094_vm4 = vmmov %vm3089_vm2 }
 0x241   : > { %v1165_v7 = vrot.slane %v1079_v0, 4  ;;  %v1166_v53 = vrot.slane %v1078_v36, 4  ;;  %v1195_v49 = vsel %vm682_vm6, %v1050_v51, %v1150_v5  ;;  %v1019_v20 = vsel %vm3097_vm12, %v1013_v27, %v1816_v58  ;;  %vm3104_vm2 = vmmov %vm3099_vm1 }
 0x242   : > { %1356 = vmatpush.msrb.mxu3 %v2708_v18  ;;  %v1333_v18 = vld [vmem:[%s3024_s6] sm:$0xf]  ;;  %v1020_v25 = vsel %vm3098_vm13, %v1815_v34, %v1013_v27 }
 0x243   : > { %v1200_v48 = vsel %vm682_vm6, %v2605_v61, %v1165_v7  ;;  %v1201_v40 = vsel %vm682_vm6, %v2627_v60, %v1166_v53 }
 0x244   : > { %1357 = vmatpush.msrb.mxu3 %v2784_v63  ;;  %1286 = vmatpush.msrb.mxu0 %v1200_v48 }
 0x245   : > { %1306 = vmatpush.msrb.mxu1 %v1201_v40  ;;  %1416 = vmatpush.msra.mxu2 %v1201_v40 }
 0x246   : > { %1358 = vmatpush.msrb.mxu3 %v2804_v11  ;;  %1287 = vmatpush.msrb.mxu0 %v1195_v49 }
 0x247   : > { %1307 = vmatpush.msrb.mxu1 %v1196_v12  ;;  %1604 = vmatmul.msk.f32.vlgmr.msrb.gmra.mxu3 %vm3094_vm4, %v1333_v18  ;;  %v1028_v61 = vpop.permute.xlu1 %1027 }
 0x248   : > { %1417 = vmatpush.msra.mxu2 %v1196_v12  ;;  %1611 = vmatpush.msk.msra.mxu3 %vm682_vm6, %v2815_v6  ;;  %v1034_v60 = vsel %vm3095_vm10, %v1028_v61, %v1806_v28  ;;  %v1035_v63 = vsel %vm3096_vm11, %v1805_v59, %v1028_v61  ;;  %v1338_v59 = vpop.permute.xlu2 %1337 }
 0x249   : > { %v1135_v11 = vrot.slane %v1035_v63, 4  ;;  %v1136_v57 = vrot.slane %v1034_v60, 4 }
 0x24a   : > { %1435 = vmatpush.msra.mxu3 %v2831_v46 }
 0x24b   : > { %v1190_v6 = vsel %vm682_vm6, %v1020_v25, %v1135_v11  ;;  %v1191_v50 = vsel %vm682_vm6, %v1019_v20, %v1136_v57 }
 0x24c   : > { %1436 = vmatpush.msra.mxu3 %v2847_v9  ;;  %1288 = vmatpush.msrb.mxu0 %v1190_v6 }
 0x24d   : > { %1308 = vmatpush.msrb.mxu1 %v1191_v50  ;;  %1418 = vmatpush.msra.mxu2 %v1191_v50 }
 0x24e   : > { %1437 = vmatpush.msra.mxu3 %v2859_v42  ;;  %1605 = vmatpush.msk.msra.mxu0 %vm682_vm6, %v2687_v30 }
 0x24f   : > { %1607 = vmatpush.msk.msra.mxu1 %vm682_vm6, %v2875_v33  ;;  %1610 = vmatmul.msk.f32.vlgmr.msra.gmra.mxu2 %vm3099_vm1, %v1333_v18 }
 0x250   : > { %1598 = vmatmul.msk.f32.vlgmr.msrb.gmra.mxu0 %vm3100_vm3, %v2794_v38  ;;  %1600 = vmatmul.msk.f32.vlgmr.msrb.gmra.mxu1 %vm3101_vm8, %v2794_v38 }
 0x251   : > { %1438 = vmatpush.msra.mxu3 %v1192_v15  ;;  %1375 = vmatpush.msra.mxu0 %v2728_v43 }
 0x252   : > { %1395 = vmatpush.msra.mxu1 %v2883_v31  ;;  %1612 = vmatmul.msk.f32.vlgmr.msra.gmra.mxu3 %vm3102_vm9, %v1333_v18  ;;  %v1453_v31 = vld.sshfl [vmem:[#allocation1] sm:$0xff pattern:$0x75316420] }
 0x253   : > { %1376 = vmatpush.msra.mxu0 %v2749_v52 }
 0x254   : > { %1396 = vmatpush.msra.mxu1 %v1200_v48 }
 0x255   : > { %1377 = vmatpush.msra.mxu0 %v2787_v29 }
 0x256   : > { %1397 = vmatpush.msra.mxu1 %v1195_v49 }
 0x257   : > { %1378 = vmatpush.msra.mxu0 %v2896_v17 }
 0x258   : > { %1398 = vmatpush.msra.mxu1 %v1190_v6  ;;  %1606 = vmatmul.msk.f32.vlgmr.msra.gmra.mxu0 %vm3103_vm14, %v1333_v18 }
 0x259   : > { %1608 = vmatmul.msk.f32.vlgmr.msra.gmra.mxu1 %vm3104_vm2, %v1333_v18 }
 0x290   : > { %v1213_v52 = vpop.permute.xlu1 %1212 }
 0x2b2   : > { %v1250_v14 = vpop.f32.mrf.mxu2 }
 0x2b3   : > { %v1251_v2 = vadd.f32 %v1250_v14, %v1213_v52 }
 0x2c0   : > { %v1270_v30 = vpop.f32.mrf.mxu3  ;;  %v1330_v43 = vpop.f32.mrf.mxu2 }
 0x2c1   : > { %v1331_v4 = vadd.f32 %v1330_v43, %v1213_v52  ;;  %v1271_v16 = vadd.f32 %v1270_v30, %v1213_v52 }
 0x2ca   : > { %v1360_v38 = vpop.f32.mrf.mxu3 }
 0x2cb   : > { %v1361_v56 = vadd.f32 %v1360_v38, %v1338_v59 }
 0x2cd   : > { %v1290_v45 = vpop.f32.mrf.mxu0  ;;  %v1310_v28 = vpop.f32.mrf.mxu1  ;;  %v1443_v58 = vmax.f32 %v1251_v2, %v1361_v56 }
 0x2ce   : > { %v1311_v54 = vadd.f32 %v1310_v28, %v1213_v52  ;;  %v1291_v39 = vadd.f32 %v1290_v45, %v1213_v52 }
 0x2cf   : > { %v1463_v19 = vadd.f32 %v1453_v31, %v1443_v58 }
 0x2d2   : > { %v1420_v46 = vpop.f32.mrf.mxu2 }
 0x2d3   : > { %v1421_v29 = vadd.f32 %v1420_v46, %v1338_v59 }
 0x2d5   : > { %v1446_v9 = vmax.f32 %v1311_v54, %v1421_v29  ;;  %v1440_v55 = vpop.f32.mrf.mxu3  ;;  %v1380_v8 = vpop.f32.mrf.mxu0 }
 0x2d6   : > { %v1441_v42 = vadd.f32 %v1440_v55, %v1338_v59  ;;  %v1381_v26 = vadd.f32 %v1380_v8, %v1338_v59  ;;  %v1400_v32 = vpop.f32.mrf.mxu1 }
 0x2d7   : > { %v1466_v47 = vadd.f32 %v1456_v22, %v1446_v9  ;;  %v1401_v33 = vadd.f32 %v1400_v32, %v1338_v59 }
 0x2d8   : > { %v1447_v34 = vmax.f32 %v1331_v4, %v1441_v42  ;;  %v1444_v35 = vmax.f32 %v1271_v16, %v1381_v26 }
 0x2d9   : > { %v1473_v41 = vrot.slane %v1466_v47, 4  ;;  %v1445_v24 = vmax.f32 %v1291_v39, %v1401_v33 }
 0x2da   : > { %v1467_v44 = vadd.f32 %v1457_v13, %v1447_v34  ;;  %v1464_v17 = vadd.f32 %v1454_v1, %v1444_v35 }
 0x2db   : > { %v1465_v15 = vadd.f32 %v1455_v21, %v1445_v24 }
 0x2dc   : > { %1480 = vst [vmem:[%s350_s18 + $0x10] sm:$0xf] %v1467_v44  ;;  %v1472_v10 = vrot.slane %v1464_v17, 4 }
 0x2dd   : > { %v1475_v23 = vsel %vm682_vm6, %v1465_v15, %v1473_v41 }
 0x2de   : > { %v1474_v3 = vsel %vm682_vm6, %v1463_v19, %v1472_v10  ;;  %1479 = vst [vmem:[%s350_s18 + $0x8] sm:$0xff] %v1475_v23 }
 0x2df   : > { %1478 = vst [vmem:[%s350_s18] sm:$0xff] %v1474_v3 }
 0x2e0   : > { %1875 = shalt.err (!%p1872_p7)
}
 0x2e1   : > { %1622 = dma.vmem_to_hbm [thread:$0]  (%p2021_p11), %s1496_s17, 320, %s1498_s23, %s1482_s27  }
 0x2e2 PF: > { %s1509_s16 = sand.u32 1, %s1902_s30   ;;  %p1629_p8 = pnand %p1570_p9, %p2025_p12 }
 0x2e3   : > { %s1510_s25 = scalar_lea.sflag [#allocation4], %s1509_s16 }
 0x2e4   : > { %p1630_p10 = pneg %p1629_p8 }
 0x2e6   : > { %1897 = dma.done.wait (%p1630_p10), %s1510_s25, 320  }
 0x2e7   : > { %1899 = vsyncadd (%p1630_p10), %s1510_s25, 4294966976  ;;  %s3106_s12 = sld [smem:[#allocation9_spill]]  ;;  %s3109_s30 = smov %s1906_s10 }
 0x2e8   : > { %s3107_s26 = sld [smem:[#allocation8_spill]] }
 0x2e9   : > { %s3108_s11 = sld [smem:[#allocation10_spill]] }
 0x2ed   : > { %p22_p0 = scmp.ge.s32.totalorder %s3106_s12, 4  }
 0x2ee   : > { %s3110_s10 = smov %s3107_s26 }
 0x2ef   :  { %24 = sbr.rel (!%p22_p0) target bundleno = 5 (0x5), region = 121 }
 0x2f4   :  { %1516 = vsyncpa [#allocation3], 1 }
 0x2f5   :  { %1518 = vsyncpa [#allocation3 + $0x1], 1 }
 0x2f6   :  { %1519 = vsyncpa [#allocation4], 1 }
 0x2f7   :  { %1521 = vsyncpa [#allocation4 + $0x1], 1 }

</bundles_post_ra>
